<compile_context>
chip_gen: v6e
topology: v6e:2x2x1
jax: 0.10.0
libtpu: 0.0.40
codegen_flags: <defaults>
</compile_context>

<pallas_src>
import jax
import jax.numpy as jnp
from jax.experimental import pallas as pl
from jax.experimental.pallas import tpu as pltpu


def _mlp_kernel(x_ref, w1_ref, b1_ref, w2_ref, b2_ref, out_ref):
    # x:  (TILE_B, obs)   w1: (obs, H)   b1: (1, H)
    # w2: (H, A_PAD)      b2: (1, A_PAD) out: (TILE_B, A_PAD)
    x = x_ref[...]
    obs = x_ref.shape[1]

    # --- Layer 1 on the VPU: obs is tiny, unroll K as broadcast FMAs. ---
    h = b1_ref[...] + x[:, 0:1] * w1_ref[0:1, :]          # (TILE_B, H)
    for k in range(1, obs):
        h = h + x[:, k:k + 1] * w1_ref[k:k + 1, :]
    h = jnp.maximum(h, 0.0)                                # ReLU (VPU)

    # --- Layer 2 on the MXU: N is lane-dense (padded to 128), f32 accum. ---
    o = jnp.dot(h, w2_ref[...], preferred_element_type=jnp.float32) + b2_ref[...]
    out_ref[...] = o.astype(out_ref.dtype)


def net_forward(x, w1, b1, w2, b2, *, tile_b=512):
    """Fused MLP forward, batched over a tiled/pipelined B grid axis."""
    B, obs = x.shape
    H, A = w2.shape
    A_PAD = 128  # lane-dense output slab

    # Pad the action axis of the second layer so the output store is unmasked.
    w2_p = jnp.zeros((H, A_PAD), w2.dtype).at[:, :A].set(w2)
    b2_p = jnp.zeros((1, A_PAD), b2.dtype).at[:, :A].set(b2)

    # Choose a batch tile (multiple of 8, no larger than the padded batch).
    b_round8 = max(8, -(-B // 8) * 8)
    tile_b = min(tile_b, b_round8)
    b_pad = -(-B // tile_b) * tile_b
    if b_pad != B:
        x = jnp.pad(x, ((0, b_pad - B), (0, 0)))
    grid = (b_pad // tile_b,)

    # Advisory cost hint so XLA schedules the call sensibly.
    flops = 2 * b_pad * (obs * H + H * A_PAD)
    bytes_accessed = 4 * (b_pad * obs + obs * H + H + H * A_PAD + A_PAD
                          + b_pad * A_PAD)
    cost = pl.CostEstimate(flops=flops, transcendentals=0,
                           bytes_accessed=bytes_accessed)

    out = pl.pallas_call(
        _mlp_kernel,
        out_shape=jax.ShapeDtypeStruct((b_pad, A_PAD), jnp.float32),
        grid_spec=pltpu.PrefetchScalarGridSpec(
            num_scalar_prefetch=0,
            grid=grid,
            in_specs=[
                pl.BlockSpec((tile_b, obs), lambda i: (i, 0)),   # streamed
                pl.BlockSpec((obs, H), lambda i: (0, 0)),        # resident
                pl.BlockSpec((1, H), lambda i: (0, 0)),          # resident
                pl.BlockSpec((H, A_PAD), lambda i: (0, 0)),      # resident
                pl.BlockSpec((1, A_PAD), lambda i: (0, 0)),      # resident
            ],
            out_specs=pl.BlockSpec((tile_b, A_PAD), lambda i: (i, 0)),
        ),
        compiler_params=pltpu.CompilerParams(
            # Batch tiles are independent -> "parallel" (shards across the
            # 2 TensorCores on v7x; no-op on v5e/v6e).
            dimension_semantics=("parallel",),
        ),
        cost_estimate=cost,
    )(x, w1, b1, w2_p, b2_p)

    return out[:B, :A]


def init_params(key, obs_size, hidden_size, n_actions):
    """Deterministic synthetic params matching nn.Linear shapes (stored transposed)."""
    k1, k2, k3, k4 = jax.random.split(key, 4)
    # PyTorch Linear: weight (out, in), bias (out,). We keep (in, out) + (1, out).
    w1 = jax.random.normal(k1, (obs_size, hidden_size), jnp.float32) * 0.1
    b1 = jax.random.normal(k2, (1, hidden_size), jnp.float32) * 0.1
    w2 = jax.random.normal(k3, (hidden_size, n_actions), jnp.float32) * 0.1
    b2 = jax.random.normal(k4, (1, n_actions), jnp.float32) * 0.1
    return w1, b1, w2, b2


if __name__ == "__main__":
    # CartPole-v0: obs_size=4, n_actions=2; small hidden for the demo.
    # Batch of 1000 states (not a tile multiple -> exercises the padding path).
    obs_size, hidden_size, n_actions = 4, 32, 2
    batch = 1000

    key = jax.random.PRNGKey(0)
    kx, kp = jax.random.split(key)
    x = jax.random.normal(kx, (batch, obs_size), jnp.float32)
    w1, b1, w2, b2 = init_params(kp, obs_size, hidden_size, n_actions)

    out = net_forward(x, w1, b1, w2, b2)
    jax.block_until_ready(out)

    # Pure-JAX reference check (same math as the PyTorch module).
    ref = jnp.maximum(x @ w1 + b1, 0.0) @ w2 + b2
    assert out.shape == (batch, n_actions)
    assert jnp.allclose(out, ref, atol=1e-5, rtol=1e-5)

    print("KERNEL_OK")
</pallas_src>

<mosaic_0001>
module attributes {stable_mosaic.version = 11 : i64} {
  func.func @_mlp_kernel(%arg0: i32, %arg1: memref<512x4xf32, #tpu.memory_space<vmem>>, %arg2: memref<4x32xf32, #tpu.memory_space<vmem>>, %arg3: memref<1x32xf32, #tpu.memory_space<vmem>>, %arg4: memref<32x128xf32, #tpu.memory_space<vmem>>, %arg5: memref<1x128xf32, #tpu.memory_space<vmem>>, %arg6: memref<512x128xf32, #tpu.memory_space<vmem>>) attributes {dimension_semantics = [#tpu.dimension_semantics<parallel>], iteration_bounds = array<i64: 2>, scalar_prefetch = 0 : i64, scratch_operands = 0 : i64, tpu.core_type = #tpu.core_type<tc>, window_params = [{transform_indices = @transform_0, window_bounds = array<i64: 512, 4>}, {pipeline_mode = #tpu.pipeline_mode<synchronous>, transform_indices = @transform_1, window_bounds = array<i64: 4, 32>}, {pipeline_mode = #tpu.pipeline_mode<synchronous>, transform_indices = @transform_2, window_bounds = array<i64: 1, 32>}, {pipeline_mode = #tpu.pipeline_mode<synchronous>, transform_indices = @transform_3, window_bounds = array<i64: 32, 128>}, {pipeline_mode = #tpu.pipeline_mode<synchronous>, transform_indices = @transform_4, window_bounds = array<i64: 1, 128>}, {transform_indices = @transform_5, window_bounds = array<i64: 512, 128>}]} {
    %c0 = arith.constant 0 : index
    %c0_0 = arith.constant 0 : index
    %0 = vector.load %arg1[%c0, %c0_0] : memref<512x4xf32, #tpu.memory_space<vmem>>, vector<512x4xf32>
    %c0_1 = arith.constant 0 : index
    %c0_2 = arith.constant 0 : index
    %1 = vector.load %arg3[%c0_1, %c0_2] : memref<1x32xf32, #tpu.memory_space<vmem>>, vector<1x32xf32>
    %2 = vector.extract_strided_slice %0 {offsets = [0, 0], sizes = [512, 1], strides = [1, 1]} : vector<512x4xf32> to vector<512x1xf32>
    %c0_3 = arith.constant 0 : index
    %c0_4 = arith.constant 0 : index
    %3 = vector.load %arg2[%c0_3, %c0_4] : memref<4x32xf32, #tpu.memory_space<vmem>>, vector<1x32xf32>
    %4 = vector.broadcast %2 : vector<512x1xf32> to vector<512x32xf32>
    %5 = vector.broadcast %3 : vector<1x32xf32> to vector<512x32xf32>
    %6 = arith.mulf %4, %5 : vector<512x32xf32>
    %7 = vector.broadcast %1 : vector<1x32xf32> to vector<512x32xf32>
    %8 = arith.addf %7, %6 : vector<512x32xf32>
    %9 = vector.extract_strided_slice %0 {offsets = [0, 1], sizes = [512, 1], strides = [1, 1]} : vector<512x4xf32> to vector<512x1xf32>
    %c1 = arith.constant 1 : index
    %c0_5 = arith.constant 0 : index
    %10 = vector.load %arg2[%c1, %c0_5] : memref<4x32xf32, #tpu.memory_space<vmem>>, vector<1x32xf32>
    %11 = vector.broadcast %9 : vector<512x1xf32> to vector<512x32xf32>
    %12 = vector.broadcast %10 : vector<1x32xf32> to vector<512x32xf32>
    %13 = arith.mulf %11, %12 : vector<512x32xf32>
    %14 = arith.addf %8, %13 : vector<512x32xf32>
    %15 = vector.extract_strided_slice %0 {offsets = [0, 2], sizes = [512, 1], strides = [1, 1]} : vector<512x4xf32> to vector<512x1xf32>
    %c2 = arith.constant 2 : index
    %c0_6 = arith.constant 0 : index
    %16 = vector.load %arg2[%c2, %c0_6] : memref<4x32xf32, #tpu.memory_space<vmem>>, vector<1x32xf32>
    %17 = vector.broadcast %15 : vector<512x1xf32> to vector<512x32xf32>
    %18 = vector.broadcast %16 : vector<1x32xf32> to vector<512x32xf32>
    %19 = arith.mulf %17, %18 : vector<512x32xf32>
    %20 = arith.addf %14, %19 : vector<512x32xf32>
    %21 = vector.extract_strided_slice %0 {offsets = [0, 3], sizes = [512, 1], strides = [1, 1]} : vector<512x4xf32> to vector<512x1xf32>
    %c3 = arith.constant 3 : index
    %c0_7 = arith.constant 0 : index
    %22 = vector.load %arg2[%c3, %c0_7] : memref<4x32xf32, #tpu.memory_space<vmem>>, vector<1x32xf32>
    %23 = vector.broadcast %21 : vector<512x1xf32> to vector<512x32xf32>
    %24 = vector.broadcast %22 : vector<1x32xf32> to vector<512x32xf32>
    %25 = arith.mulf %23, %24 : vector<512x32xf32>
    %26 = arith.addf %20, %25 : vector<512x32xf32>
    %cst = arith.constant 0.000000e+00 : f32
    %27 = vector.broadcast %cst : f32 to vector<512x32xf32>
    %28 = arith.maximumf %26, %27 : vector<512x32xf32>
    %c0_8 = arith.constant 0 : index
    %c0_9 = arith.constant 0 : index
    %29 = vector.load %arg4[%c0_8, %c0_9] : memref<32x128xf32, #tpu.memory_space<vmem>>, vector<32x128xf32>
    %cst_10 = arith.constant dense<0.000000e+00> : vector<512x128xf32>
    %30 = tpu.matmul %28, %29, %cst_10 {dimension_numbers = #tpu.dot_dimension_numbers<[1], [0], [0], [1], [0, 0, 1, 1], [], []>} : vector<512x32xf32>, vector<32x128xf32>, vector<512x128xf32> -> vector<512x128xf32>
    %c0_11 = arith.constant 0 : index
    %c0_12 = arith.constant 0 : index
    %31 = vector.load %arg5[%c0_11, %c0_12] : memref<1x128xf32, #tpu.memory_space<vmem>>, vector<1x128xf32>
    %32 = vector.broadcast %31 : vector<1x128xf32> to vector<512x128xf32>
    %33 = arith.addf %30, %32 : vector<512x128xf32>
    %c0_13 = arith.constant 0 : index
    %c0_14 = arith.constant 0 : index
    %34 = vector.load %arg6[%c0_13, %c0_14] : memref<512x128xf32, #tpu.memory_space<vmem>>, vector<512x128xf32>
    tpu.vector_store %arg6[%c0_13, %c0_14], %33 {strides = array<i32>} : memref<512x128xf32, #tpu.memory_space<vmem>>, vector<512x128xf32>,
    return
  }
  func.func @transform_0(%arg0: i32) -> (i32, i32) {
    %c0_i32 = arith.constant 0 : i32
    %c0_i32_0 = arith.constant 0 : i32
    return %arg0, %c0_i32 : i32, i32
  }
  func.func @transform_1(%arg0: i32) -> (i32, i32) {
    %c0_i32 = arith.constant 0 : i32
    %c0_i32_0 = arith.constant 0 : i32
    %c0_i32_1 = arith.constant 0 : i32
    return %c0_i32, %c0_i32_0 : i32, i32
  }
  func.func @transform_2(%arg0: i32) -> (i32, i32) {
    %c0_i32 = arith.constant 0 : i32
    %c0_i32_0 = arith.constant 0 : i32
    %c0_i32_1 = arith.constant 0 : i32
    return %c0_i32, %c0_i32_0 : i32, i32
  }
  func.func @transform_3(%arg0: i32) -> (i32, i32) {
    %c0_i32 = arith.constant 0 : i32
    %c0_i32_0 = arith.constant 0 : i32
    %c0_i32_1 = arith.constant 0 : i32
    return %c0_i32, %c0_i32_0 : i32, i32
  }
  func.func @transform_4(%arg0: i32) -> (i32, i32) {
    %c0_i32 = arith.constant 0 : i32
    %c0_i32_0 = arith.constant 0 : i32
    %c0_i32_1 = arith.constant 0 : i32
    return %c0_i32, %c0_i32_0 : i32, i32
  }
  func.func @transform_5(%arg0: i32) -> (i32, i32) {
    %c0_i32 = arith.constant 0 : i32
    %c0_i32_0 = arith.constant 0 : i32
    return %arg0, %c0_i32 : i32, i32
  }
}

</mosaic_0001>

<bundles_post_ra>
// kernel: tpu_custom_call.1
= control target key start
LH: loop header
LB: loop body
LE: loop exit
PB: predicated region body
PF: predicated region fallthrough
CT: control target
= control target key end

     0   :  { %10 = vsyncpa [#allocation3], 0  ;;  %s4922_s0 = inlined_call_operand.vmem [shape: f32[1024,4], index: 0, kind: input, shape index: {}]   ;;  %s4923_s1 = inlined_call_operand.vmem [shape: f32[4,32], index: 1, kind: input, shape index: {}]   ;;  %s4924_s2 = inlined_call_operand.vmem [shape: f32[1,32], index: 2, kind: input, shape index: {}]   ;;  %s4925_s3 = inlined_call_operand.vmem [shape: f32[32,128], index: 3, kind: input, shape index: {}]   ;;  %s4926_s4 = inlined_call_operand.vmem [shape: f32[1,128], index: 4, kind: input, shape index: {}]   ;;  %s4927_s5 = inlined_call_operand.hbm [shape: f32[1024,128], index: 5, kind: output, shape index: {}]  }
   0x1   :  { %12 = vsyncpa [#allocation3 + $0x1], 0  ;;  %s3160_s18 = smov 0   ;;  %s3162_s19 = smov 0  }
   0x2   :  { %s3164_s20 = smov 0   ;;  %s3166_s21 = smov 0  }
   0x3 LB: > { %s3181_s22 = sadd.s32 4294967295, %s3121_s21   ;;  %s2710_s23 = sadd.s32 4294967294, %s3121_s21   ;;  %s3121_s21 = sphi %s3166_s21, %s5325_s21   ;;  %s3117_s20 = sphi %s3164_s20, %s5324_s20   ;;  %s3113_s19 = sphi %s3162_s19, %s5323_s19   ;;  %s3109_s18 = sphi %s3160_s18, %s5322_s18  }
   0x4   : > { %s3185_s24 = sadd.s32 1, %s3121_s21   ;;  %s135_s25 = sadd.s32 1, %s3117_s20 }
   0x5   : > { %s132_s26 = ssub.s32 %s3121_s21, %s3185_s24  ;;  %p145_p0 = scmp.ne.s32.totalorder %s3117_s20, %s3113_s19 }
   0x6   : > { %p133_p1 = scmp.eq.s32.totalorder %s132_s26, 0  ;;  %p146_p2 = scmp.eq.s32.totalorder %s3181_s22, 1 }
   0x7   : > { %p151_p3 = scmp.ne.s32.totalorder %s3113_s19, %s3109_s18  ;;  %p152_p4 = scmp.eq.s32.totalorder %s2710_s23, 1 }
   0x8   : > { %s3196_s27 = scalar_select %p133_p1, %s3117_s20, %s135_s25  }
   0x9   : > { %p3198_p5 = por %p146_p2, %p145_p0  ;;  %p3202_p6 = por %p152_p4, %p151_p3 }
   0xa   : > { %p2713_p7 = scmp.ge.s32.totalorder %s3121_s21, 1  ;;  %p191_p8 = scmp.lt.s32.totalorder %s3121_s21, 3 }
   0xc   : > { %p192_p9 = pnand %p2713_p7, %p191_p8 }
   0xe   : > { %195 = sbr.rel (%p192_p9) target bundleno = 936 (0x3a8), region = 40 }
  0x13   : > { %s2715_s30 = sshll.u32 %s3181_s22, 6  ;;  %v3123_v0 = vmov 0   ;;  %vm1992_vm0 = vcmask 261120   ;;  %s2792_s12 = sshll.u32 %s3181_s22, 13 }
  0x14   : > { %3019 = vset.pattern.permute.xlu1 %v3123_v0  ;;  %3018 = vset.pattern.permute.xlu0 %v3123_v0  ;;  %p220_p10 = scmp.lt.s32.totalorder %s2715_s30, 127  ;;  %s4873_s15 = scalar_lea.hbm %s4927_s5, %s2792_s12 }
  0x15   : > { %s3127_s17 = smov [#allocation2]  }
  0x16   : > { %s5327_s30 = smov (!%p220_p10, %s2715_s30), 127  ;;  %s3065_s23 = sshll.u32 %s3127_s17, 4  ;;  %s3066_s23 = int_to_ptr.vmem [resolvable:$false] %s3065_s23 }
  0x17   : > { %s2716_s6 = sshll.u32 %s5327_s30, 3  ;;  %s3067_s25 = scalar_lea.vmem %s3066_s23, 16384 }
  0x18   : > { %s3212_s9 = scalar_lea.vmem %s4922_s0, %s2716_s6  ;;  %s216_s6 = sand.u32 1, %s3113_s19  }
  0x19   : > { %v3215_v1 = vld [vmem:[%s3212_s9 + $0x10] sm:$0xff]  ;;  %v3218_v2 = vld [vmem:[%s3212_s9] sm:$0xff]  ;;  %v3223_v3 = vld [vmem:[%s3212_s9 + $0x18] sm:$0xff]  ;;  %s2714_s7 = sshll.u32 %s216_s6, 9  ;;  %s4882_s22 = scalar_lea.sflag [#allocation3], %s216_s6 }
  0x1a   : > { %304 = vperm.xlu1 %3019, %v3215_v1   ;;  %294 = vperm.xlu0 %3018, %v3218_v2   ;;  %v3226_v4 = vld [vmem:[%s3212_s9 + $0x8] sm:$0xff]  ;;  %v3234_v6 = vld [vmem:[%s3212_s9 + $0x20] sm:$0xff]  ;;  %v3239_v7 = vld [vmem:[%s3212_s9 + $0x38] sm:$0xff]  ;;  %s4742_s11 = scalar_lea.vmem [#allocation2], %s2714_s7 }
  0x1b   : > { %v3231_v5 = vld [vmem:[%s3212_s9 + $0x28] sm:$0xff]  ;;  %v3242_v8 = vld [vmem:[%s3212_s9 + $0x30] sm:$0xff]  ;;  %v3250_v10 = vld [vmem:[%s3212_s9 + $0x40] sm:$0xff] }
  0x1c   : > { %v3247_v9 = vld [vmem:[%s3212_s9 + $0x48] sm:$0xff]  ;;  %v3255_v11 = vld [vmem:[%s3212_s9 + $0x58] sm:$0xff]  ;;  %v3258_v12 = vld [vmem:[%s3212_s9 + $0x50] sm:$0xff] }
  0x1d   : > { %v3263_v13 = vld [vmem:[%s3212_s9 + $0x68] sm:$0xff]  ;;  %v3266_v14 = vld [vmem:[%s3212_s9 + $0x60] sm:$0xff]  ;;  %v3271_v15 = vld [vmem:[%s3212_s9 + $0x78] sm:$0xff] }
  0x1e   : > { %309 = vperm.xlu1 %3019, %v3223_v3   ;;  %299 = vperm.xlu0 %3018, %v3226_v4   ;;  %v3274_v16 = vld [vmem:[%s3212_s9 + $0x70] sm:$0xff]  ;;  %v3279_v17 = vld [vmem:[%s3212_s9 + $0x88] sm:$0xff]  ;;  %v3282_v18 = vld [vmem:[%s3212_s9 + $0x80] sm:$0xff] }
  0x1f   : > { %v3287_v19 = vld [vmem:[%s3212_s9 + $0x98] sm:$0xff]  ;;  %v3290_v20 = vld [vmem:[%s3212_s9 + $0x90] sm:$0xff]  ;;  %v3295_v21 = vld [vmem:[%s3212_s9 + $0xa8] sm:$0xff] }
  0x20   : > { %v3298_v22 = vld [vmem:[%s3212_s9 + $0xa0] sm:$0xff]  ;;  %v3303_v23 = vld [vmem:[%s3212_s9 + $0xb8] sm:$0xff]  ;;  %v3306_v24 = vld [vmem:[%s3212_s9 + $0xb0] sm:$0xff] }
  0x21   : > { %v3311_v25 = vld [vmem:[%s3212_s9 + $0xc8] sm:$0xff]  ;;  %v3314_v26 = vld [vmem:[%s3212_s9 + $0xc0] sm:$0xff]  ;;  %v3319_v27 = vld [vmem:[%s3212_s9 + $0xd8] sm:$0xff] }
  0x22   : > { %319 = vperm.xlu1 %3019, %v3231_v5   ;;  %314 = vperm.xlu0 %3018, %v3234_v6   ;;  %v3322_v28 = vld [vmem:[%s3212_s9 + $0xd0] sm:$0xff]  ;;  %v3327_v29 = vld [vmem:[%s3212_s9 + $0xe8] sm:$0xff]  ;;  %v3330_v30 = vld [vmem:[%s3212_s9 + $0xe0] sm:$0xff] }
  0x23   : > { %v3335_v31 = vld [vmem:[%s3212_s9 + $0xf8] sm:$0xff]  ;;  %v3338_v32 = vld [vmem:[%s3212_s9 + $0xf0] sm:$0xff]  ;;  %v3343_v33 = vld [vmem:[%s3212_s9 + $0x108] sm:$0xff] }
  0x24   : > { %v3346_v34 = vld [vmem:[%s3212_s9 + $0x100] sm:$0xff]  ;;  %v3351_v35 = vld [vmem:[%s3212_s9 + $0x118] sm:$0xff]  ;;  %v3354_v36 = vld [vmem:[%s3212_s9 + $0x110] sm:$0xff] }
  0x25   : > { %v3359_v37 = vld [vmem:[%s3212_s9 + $0x128] sm:$0xff]  ;;  %v3362_v38 = vld [vmem:[%s3212_s9 + $0x120] sm:$0xff]  ;;  %v3367_v39 = vld [vmem:[%s3212_s9 + $0x138] sm:$0xff] }
  0x26   : > { %329 = vperm.xlu1 %3019, %v3239_v7   ;;  %324 = vperm.xlu0 %3018, %v3242_v8   ;;  %v3370_v40 = vld [vmem:[%s3212_s9 + $0x130] sm:$0xff]  ;;  %v3375_v41 = vld [vmem:[%s3212_s9 + $0x148] sm:$0xff]  ;;  %v3378_v42 = vld [vmem:[%s3212_s9 + $0x140] sm:$0xff] }
  0x27   : > { %v3383_v43 = vld [vmem:[%s3212_s9 + $0x158] sm:$0xff]  ;;  %v3386_v44 = vld [vmem:[%s3212_s9 + $0x150] sm:$0xff]  ;;  %v3391_v45 = vld [vmem:[%s3212_s9 + $0x168] sm:$0xff] }
  0x28   : > { %v3394_v46 = vld [vmem:[%s3212_s9 + $0x160] sm:$0xff]  ;;  %v3399_v47 = vld [vmem:[%s3212_s9 + $0x178] sm:$0xff]  ;;  %v3402_v48 = vld [vmem:[%s3212_s9 + $0x170] sm:$0xff] }
  0x29   : > { %4959 = vst [vmem:[#allocation5_spill] sm:$0xff] %v3402_v48  ;;  %v3407_v49 = vld [vmem:[%s3212_s9 + $0x188] sm:$0xff]  ;;  %v3410_v50 = vld [vmem:[%s3212_s9 + $0x180] sm:$0xff]  ;;  %v3415_v51 = vld [vmem:[%s3212_s9 + $0x198] sm:$0xff] }
  0x2a   : > { %339 = vperm.xlu1 %3019, %v3247_v9   ;;  %334 = vperm.xlu0 %3018, %v3250_v10   ;;  %4960 = vst [vmem:[#allocation6_spill] sm:$0xff] %v3410_v50  ;;  %v3418_v52 = vld [vmem:[%s3212_s9 + $0x190] sm:$0xff]  ;;  %v3423_v53 = vld [vmem:[%s3212_s9 + $0x1a8] sm:$0xff]  ;;  %v3426_v54 = vld [vmem:[%s3212_s9 + $0x1a0] sm:$0xff] }
  0x2b   : > { %4961 = vst [vmem:[#allocation7_spill] sm:$0xff] %v3418_v52  ;;  %4962 = vst [vmem:[#allocation8_spill] sm:$0xff] %v3426_v54  ;;  %v3431_v55 = vld [vmem:[%s3212_s9 + $0x1b8] sm:$0xff]  ;;  %v3434_v56 = vld [vmem:[%s3212_s9 + $0x1b0] sm:$0xff] }
  0x2c   : > { %4963 = vst [vmem:[#allocation9_spill] sm:$0xff] %v3431_v55  ;;  %4964 = vst [vmem:[#allocation10_spill] sm:$0xff] %v3434_v56  ;;  %v3439_v57 = vld [vmem:[%s3212_s9 + $0x1c8] sm:$0xff]  ;;  %v3442_v58 = vld [vmem:[%s3212_s9 + $0x1c0] sm:$0xff] }
  0x2d   : > { %4965 = vst [vmem:[#allocation11_spill] sm:$0xff] %v3439_v57  ;;  %4966 = vst [vmem:[#allocation12_spill] sm:$0xff] %v3442_v58  ;;  %v3447_v59 = vld [vmem:[%s3212_s9 + $0x1d8] sm:$0xff]  ;;  %v3450_v60 = vld [vmem:[%s3212_s9 + $0x1d0] sm:$0xff] }
  0x2e   : > { %349 = vperm.xlu1 %3019, %v3255_v11   ;;  %344 = vperm.xlu0 %3018, %v3258_v12   ;;  %4967 = vst [vmem:[#allocation13_spill] sm:$0xff] %v3447_v59  ;;  %4968 = vst [vmem:[#allocation14_spill] sm:$0xff] %v3450_v60  ;;  %v3455_v61 = vld [vmem:[%s3212_s9 + $0x1e8] sm:$0xff]  ;;  %v3458_v62 = vld [vmem:[%s3212_s9 + $0x1e0] sm:$0xff] }
  0x2f   : > { %4969 = vst [vmem:[#allocation15_spill] sm:$0xff] %v3455_v61  ;;  %v3463_v63 = vld [vmem:[%s3212_s9 + $0x1f8] sm:$0xff]  ;;  %v3466_v0 = vld [vmem:[%s3212_s9 + $0x1f0] sm:$0xff] }
  0x32   : > { %359 = vperm.xlu1 %3019, %v3263_v13   ;;  %354 = vperm.xlu0 %3018, %v3266_v14  }
  0x36   : > { %369 = vperm.xlu1 %3019, %v3271_v15   ;;  %364 = vperm.xlu0 %3018, %v3274_v16  }
  0x3a   : > { %379 = vperm.xlu1 %3019, %v3279_v17   ;;  %374 = vperm.xlu0 %3018, %v3282_v18  }
  0x3e   : > { %389 = vperm.xlu1 %3019, %v3287_v19   ;;  %384 = vperm.xlu0 %3018, %v3290_v20  }
  0x42   : > { %399 = vperm.xlu1 %3019, %v3295_v21   ;;  %394 = vperm.xlu0 %3018, %v3298_v22  }
  0x46   : > { %409 = vperm.xlu1 %3019, %v3303_v23   ;;  %404 = vperm.xlu0 %3018, %v3306_v24  }
  0x4a   : > { %419 = vperm.xlu1 %3019, %v3311_v25   ;;  %414 = vperm.xlu0 %3018, %v3314_v26  }
  0x4e   : > { %429 = vperm.xlu1 %3019, %v3319_v27   ;;  %424 = vperm.xlu0 %3018, %v3322_v28  }
  0x52   : > { %439 = vperm.xlu1 %3019, %v3327_v29   ;;  %434 = vperm.xlu0 %3018, %v3330_v30  }
  0x56   : > { %449 = vperm.xlu1 %3019, %v3335_v31   ;;  %444 = vperm.xlu0 %3018, %v3338_v32  }
  0x5a   : > { %459 = vperm.xlu1 %3019, %v3343_v33   ;;  %454 = vperm.xlu0 %3018, %v3346_v34  }
  0x5e   : > { %469 = vperm.xlu1 %3019, %v3351_v35   ;;  %464 = vperm.xlu0 %3018, %v3354_v36  }
  0x62   : > { %479 = vperm.xlu1 %3019, %v3359_v37   ;;  %474 = vperm.xlu0 %3018, %v3362_v38  }
  0x66   : > { %489 = vperm.xlu1 %3019, %v3367_v39   ;;  %484 = vperm.xlu0 %3018, %v3370_v40  }
  0x6a   : > { %499 = vperm.xlu1 %3019, %v3375_v41   ;;  %494 = vperm.xlu0 %3018, %v3378_v42  }
  0x6e   : > { %509 = vperm.xlu1 %3019, %v3383_v43   ;;  %504 = vperm.xlu0 %3018, %v3386_v44  }
  0x72   : > { %519 = vperm.xlu1 %3019, %v3391_v45   ;;  %514 = vperm.xlu0 %3018, %v3394_v46  }
  0x76   : > { %529 = vperm.xlu1 %3019, %v3399_v47   ;;  %524 = vperm.xlu0 %3018, %v3402_v48  }
  0x7a   : > { %539 = vperm.xlu1 %3019, %v3407_v49   ;;  %534 = vperm.xlu0 %3018, %v3410_v50  }
  0x7e   : > { %549 = vperm.xlu1 %3019, %v3415_v51   ;;  %544 = vperm.xlu0 %3018, %v3418_v52  }
  0x82   : > { %559 = vperm.xlu1 %3019, %v3423_v53   ;;  %554 = vperm.xlu0 %3018, %v3426_v54  }
  0x86   : > { %569 = vperm.xlu1 %3019, %v3431_v55   ;;  %564 = vperm.xlu0 %3018, %v3434_v56   ;;  %v3124_v55 = vmov 1  }
  0x8a   : > { %579 = vperm.xlu1 %3019, %v3439_v57   ;;  %574 = vperm.xlu0 %3018, %v3442_v58  }
  0x8e   : > { %589 = vperm.xlu1 %3019, %v3447_v59   ;;  %584 = vperm.xlu0 %3018, %v3450_v60  }
  0x92   : > { %599 = vperm.xlu1 %3019, %v3455_v61   ;;  %594 = vperm.xlu0 %3018, %v3458_v62  }
  0x95   : > { %v3468_v57 = vpop.permute.xlu1 %304  ;;  %v3470_v58 = vpop.permute.xlu0 %294 }
  0x96   : > { %4970 = vst [vmem:[#allocation16_spill] sm:$0xff] %v3468_v57  ;;  %4971 = vst [vmem:[#allocation17_spill] sm:$0xff] %v3470_v58  ;;  %609 = vperm.xlu1 %3019, %v3463_v63   ;;  %604 = vperm.xlu0 %3018, %v3466_v0  }
  0x99   : > { %v3474_v59 = vpop.permute.xlu1 %309  ;;  %v3476_v60 = vpop.permute.xlu0 %299 }
  0x9a   : > { %4972 = vst [vmem:[#allocation18_spill] sm:$0xff] %v3474_v59  ;;  %4973 = vst [vmem:[#allocation19_spill] sm:$0xff] %v3476_v60  ;;  %3021 = vset.pattern.permute.xlu1 %v3124_v55  ;;  %3020 = vset.pattern.permute.xlu0 %v3124_v55 }
  0x9b   : > { %756 = vperm.xlu1 %3021, %v3226_v4   ;;  %752 = vperm.xlu0 %3020, %v3218_v2  }
  0x9d   : > { %v3480_v61 = vpop.permute.xlu1 %319  ;;  %v3482_v57 = vpop.permute.xlu0 %314 }
  0x9e   : > { %4974 = vst [vmem:[#allocation20_spill] sm:$0xff] %v3480_v61  ;;  %4975 = vst [vmem:[#allocation21_spill] sm:$0xff] %v3482_v57 }
  0x9f   : > { %760 = vperm.xlu1 %3021, %v3215_v1   ;;  %764 = vperm.xlu0 %3020, %v3223_v3  }
  0xa1   : > { %v3486_v58 = vpop.permute.xlu1 %329  ;;  %v3488_v59 = vpop.permute.xlu0 %324 }
  0xa2   : > { %4976 = vst [vmem:[#allocation22_spill] sm:$0xff] %v3486_v58  ;;  %4977 = vst [vmem:[#allocation23_spill] sm:$0xff] %v3488_v59 }
  0xa3   : > { %768 = vperm.xlu1 %3021, %v3234_v6   ;;  %772 = vperm.xlu0 %3020, %v3231_v5  }
  0xa5   : > { %v3492_v55 = vpop.permute.xlu1 %339  ;;  %v3494_v60 = vpop.permute.xlu0 %334 }
  0xa6   : > { %4978 = vst [vmem:[#allocation24_spill] sm:$0xff] %v3492_v55  ;;  %4979 = vst [vmem:[#allocation25_spill] sm:$0xff] %v3494_v60 }
  0xa7   : > { %776 = vperm.xlu1 %3021, %v3242_v8   ;;  %780 = vperm.xlu0 %3020, %v3239_v7  }
  0xa9   : > { %v3498_v57 = vpop.permute.xlu1 %349  ;;  %v3500_v61 = vpop.permute.xlu0 %344 }
  0xaa   : > { %4980 = vst [vmem:[#allocation26_spill] sm:$0xff] %v3498_v57  ;;  %4981 = vst [vmem:[#allocation27_spill] sm:$0xff] %v3500_v61 }
  0xab   : > { %784 = vperm.xlu1 %3021, %v3250_v10   ;;  %788 = vperm.xlu0 %3020, %v3247_v9  }
  0xad   : > { %v3504_v59 = vpop.permute.xlu1 %359  ;;  %v3506_v58 = vpop.permute.xlu0 %354 }
  0xae   : > { %4982 = vst [vmem:[#allocation28_spill] sm:$0xff] %v3504_v59  ;;  %4983 = vst [vmem:[#allocation29_spill] sm:$0xff] %v3506_v58 }
  0xaf   : > { %792 = vperm.xlu1 %3021, %v3258_v12   ;;  %796 = vperm.xlu0 %3020, %v3255_v11  }
  0xb1   : > { %v3510_v60 = vpop.permute.xlu1 %369  ;;  %v3512_v55 = vpop.permute.xlu0 %364 }
  0xb2   : > { %4984 = vst [vmem:[#allocation30_spill] sm:$0xff] %v3510_v60  ;;  %4985 = vst [vmem:[#allocation31_spill] sm:$0xff] %v3512_v55 }
  0xb3   : > { %800 = vperm.xlu1 %3021, %v3266_v14   ;;  %804 = vperm.xlu0 %3020, %v3263_v13  }
  0xb5   : > { %v3516_v61 = vpop.permute.xlu1 %379  ;;  %v3518_v57 = vpop.permute.xlu0 %374 }
  0xb6   : > { %4986 = vst [vmem:[#allocation32_spill] sm:$0xff] %v3516_v61  ;;  %4987 = vst [vmem:[#allocation33_spill] sm:$0xff] %v3518_v57 }
  0xb7   : > { %808 = vperm.xlu1 %3021, %v3274_v16   ;;  %812 = vperm.xlu0 %3020, %v3271_v15  }
  0xb9   : > { %v3522_v58 = vpop.permute.xlu1 %389  ;;  %v3524_v59 = vpop.permute.xlu0 %384 }
  0xba   : > { %4988 = vst [vmem:[#allocation34_spill] sm:$0xff] %v3522_v58  ;;  %4989 = vst [vmem:[#allocation35_spill] sm:$0xff] %v3524_v59 }
  0xbb   : > { %816 = vperm.xlu1 %3021, %v3282_v18   ;;  %820 = vperm.xlu0 %3020, %v3279_v17  }
  0xbd   : > { %v3528_v60 = vpop.permute.xlu1 %399  ;;  %v3530_v55 = vpop.permute.xlu0 %394 }
  0xbe   : > { %4990 = vst [vmem:[#allocation36_spill] sm:$0xff] %v3528_v60  ;;  %4991 = vst [vmem:[#allocation37_spill] sm:$0xff] %v3530_v55 }
  0xbf   : > { %824 = vperm.xlu1 %3021, %v3290_v20   ;;  %828 = vperm.xlu0 %3020, %v3287_v19  }
  0xc1   : > { %v3534_v57 = vpop.permute.xlu1 %409  ;;  %v3536_v61 = vpop.permute.xlu0 %404 }
  0xc2   : > { %4992 = vst [vmem:[#allocation38_spill] sm:$0xff] %v3534_v57  ;;  %4993 = vst [vmem:[#allocation39_spill] sm:$0xff] %v3536_v61 }
  0xc3   : > { %832 = vperm.xlu1 %3021, %v3298_v22   ;;  %836 = vperm.xlu0 %3020, %v3295_v21  }
  0xc5   : > { %v3540_v59 = vpop.permute.xlu1 %419  ;;  %v3542_v58 = vpop.permute.xlu0 %414 }
  0xc6   : > { %4994 = vst [vmem:[#allocation40_spill] sm:$0xff] %v3540_v59  ;;  %4995 = vst [vmem:[#allocation41_spill] sm:$0xff] %v3542_v58 }
  0xc7   : > { %840 = vperm.xlu1 %3021, %v3306_v24   ;;  %844 = vperm.xlu0 %3020, %v3303_v23  }
  0xc9   : > { %v3546_v55 = vpop.permute.xlu1 %429  ;;  %v3548_v60 = vpop.permute.xlu0 %424 }
  0xca   : > { %4996 = vst [vmem:[#allocation42_spill] sm:$0xff] %v3546_v55  ;;  %4997 = vst [vmem:[#allocation43_spill] sm:$0xff] %v3548_v60 }
  0xcb   : > { %848 = vperm.xlu1 %3021, %v3314_v26   ;;  %852 = vperm.xlu0 %3020, %v3311_v25  }
  0xcd   : > { %v3552_v61 = vpop.permute.xlu1 %439  ;;  %v3554_v57 = vpop.permute.xlu0 %434 }
  0xce   : > { %4998 = vst [vmem:[#allocation44_spill] sm:$0xff] %v3552_v61  ;;  %4999 = vst [vmem:[#allocation45_spill] sm:$0xff] %v3554_v57 }
  0xcf   : > { %856 = vperm.xlu1 %3021, %v3322_v28   ;;  %860 = vperm.xlu0 %3020, %v3319_v27  }
  0xd1   : > { %v3558_v58 = vpop.permute.xlu1 %449  ;;  %v3560_v59 = vpop.permute.xlu0 %444 }
  0xd2   : > { %5000 = vst [vmem:[#allocation46_spill] sm:$0xff] %v3558_v58  ;;  %5001 = vst [vmem:[#allocation47_spill] sm:$0xff] %v3560_v59 }
  0xd3   : > { %864 = vperm.xlu1 %3021, %v3330_v30   ;;  %868 = vperm.xlu0 %3020, %v3327_v29  }
  0xd5   : > { %v3564_v60 = vpop.permute.xlu1 %459  ;;  %v3566_v55 = vpop.permute.xlu0 %454 }
  0xd6   : > { %5002 = vst [vmem:[#allocation48_spill] sm:$0xff] %v3564_v60  ;;  %5003 = vst [vmem:[#allocation49_spill] sm:$0xff] %v3566_v55 }
  0xd7   : > { %872 = vperm.xlu1 %3021, %v3338_v32   ;;  %876 = vperm.xlu0 %3020, %v3335_v31  }
  0xd9   : > { %v3570_v57 = vpop.permute.xlu1 %469  ;;  %v3572_v61 = vpop.permute.xlu0 %464 }
  0xda   : > { %5004 = vst [vmem:[#allocation50_spill] sm:$0xff] %v3570_v57  ;;  %5005 = vst [vmem:[#allocation51_spill] sm:$0xff] %v3572_v61 }
  0xdb   : > { %880 = vperm.xlu1 %3021, %v3346_v34   ;;  %884 = vperm.xlu0 %3020, %v3343_v33  }
  0xdd   : > { %v3576_v59 = vpop.permute.xlu1 %479  ;;  %v3578_v58 = vpop.permute.xlu0 %474 }
  0xde   : > { %5006 = vst [vmem:[#allocation52_spill] sm:$0xff] %v3576_v59  ;;  %5007 = vst [vmem:[#allocation53_spill] sm:$0xff] %v3578_v58 }
  0xdf   : > { %888 = vperm.xlu1 %3021, %v3354_v36   ;;  %892 = vperm.xlu0 %3020, %v3351_v35  }
  0xe1   : > { %v3582_v60 = vpop.permute.xlu1 %489  ;;  %v3584_v55 = vpop.permute.xlu0 %484 }
  0xe2   : > { %5008 = vst [vmem:[#allocation54_spill] sm:$0xff] %v3582_v60  ;;  %5009 = vst [vmem:[#allocation55_spill] sm:$0xff] %v3584_v55 }
  0xe3   : > { %896 = vperm.xlu1 %3021, %v3362_v38   ;;  %900 = vperm.xlu0 %3020, %v3359_v37  }
  0xe5   : > { %v3588_v61 = vpop.permute.xlu1 %499  ;;  %v3590_v57 = vpop.permute.xlu0 %494 }
  0xe6   : > { %5010 = vst [vmem:[#allocation56_spill] sm:$0xff] %v3588_v61  ;;  %5011 = vst [vmem:[#allocation57_spill] sm:$0xff] %v3590_v57 }
  0xe7   : > { %904 = vperm.xlu1 %3021, %v3370_v40   ;;  %908 = vperm.xlu0 %3020, %v3367_v39  }
  0xe9   : > { %v3594_v58 = vpop.permute.xlu1 %509  ;;  %v3596_v59 = vpop.permute.xlu0 %504 }
  0xea   : > { %5012 = vst [vmem:[#allocation58_spill] sm:$0xff] %v3594_v58  ;;  %5013 = vst [vmem:[#allocation59_spill] sm:$0xff] %v3596_v59 }
  0xeb   : > { %912 = vperm.xlu1 %3021, %v3378_v42   ;;  %916 = vperm.xlu0 %3020, %v3375_v41  }
  0xed   : > { %v3600_v60 = vpop.permute.xlu1 %519  ;;  %v3602_v55 = vpop.permute.xlu0 %514 }
  0xee   : > { %5014 = vst [vmem:[#allocation60_spill] sm:$0xff] %v3600_v60  ;;  %5015 = vst [vmem:[#allocation61_spill] sm:$0xff] %v3602_v55 }
  0xef   : > { %920 = vperm.xlu1 %3021, %v3386_v44   ;;  %924 = vperm.xlu0 %3020, %v3383_v43  }
  0xf1   : > { %v3606_v61 = vpop.permute.xlu1 %529  ;;  %v3608_v57 = vpop.permute.xlu0 %524 }
  0xf2   : > { %5016 = vst [vmem:[#allocation62_spill] sm:$0xff] %v3606_v61  ;;  %5017 = vst [vmem:[#allocation63_spill] sm:$0xff] %v3608_v57 }
  0xf3   : > { %928 = vperm.xlu1 %3021, %v3394_v46   ;;  %932 = vperm.xlu0 %3020, %v3391_v45  }
  0xf5   : > { %v3612_v58 = vpop.permute.xlu1 %539  ;;  %v3614_v59 = vpop.permute.xlu0 %534 }
  0xf6   : > { %5018 = vst [vmem:[#allocation64_spill] sm:$0xff] %v3612_v58  ;;  %5019 = vst [vmem:[#allocation65_spill] sm:$0xff] %v3614_v59 }
  0xf7   : > { %936 = vperm.xlu1 %3021, %v3402_v48   ;;  %940 = vperm.xlu0 %3020, %v3399_v47   ;;  %v5035_v48 = vld [vmem:[#allocation14_spill] sm:$0xff] }
  0xf9   : > { %v3618_v55 = vpop.permute.xlu1 %549  ;;  %v3620_v60 = vpop.permute.xlu0 %544 }
  0xfa   : > { %5020 = vst [vmem:[#allocation66_spill] sm:$0xff] %v3618_v55  ;;  %5021 = vst [vmem:[#allocation67_spill] sm:$0xff] %v3620_v60 }
  0xfb   : > { %944 = vperm.xlu1 %3021, %v3410_v50   ;;  %948 = vperm.xlu0 %3020, %v3407_v49   ;;  %v5031_v50 = vld [vmem:[#allocation12_spill] sm:$0xff] }
  0xfd   : > { %v3624_v57 = vpop.permute.xlu1 %559  ;;  %v3626_v61 = vpop.permute.xlu0 %554 }
  0xfe   : > { %5022 = vst [vmem:[#allocation68_spill] sm:$0xff] %v3624_v57  ;;  %5023 = vst [vmem:[#allocation69_spill] sm:$0xff] %v3626_v61  ;;  %v5028_v57 = vld [vmem:[#allocation9_spill] sm:$0xff] }
  0xff   : > { %952 = vperm.xlu1 %3021, %v3418_v52   ;;  %956 = vperm.xlu0 %3020, %v3415_v51  }
 0x101   : > { %v3630_v59 = vpop.permute.xlu1 %569  ;;  %v3632_v58 = vpop.permute.xlu0 %564 }
 0x102   : > { %5024 = vst [vmem:[#allocation70_spill] sm:$0xff] %v3630_v59  ;;  %5025 = vst [vmem:[#allocation71_spill] sm:$0xff] %v3632_v58  ;;  %v5032_v59 = vld [vmem:[#allocation11_spill] sm:$0xff] }
 0x103   : > { %960 = vperm.xlu1 %3021, %v3426_v54   ;;  %964 = vperm.xlu0 %3020, %v3423_v53  }
 0x105   : > { %v3636_v55 = vpop.permute.xlu1 %579  ;;  %v3638_v60 = vpop.permute.xlu0 %574 }
 0x106   : > { %5026 = vst [vmem:[#allocation72_spill] sm:$0xff] %v3636_v55  ;;  %5027 = vst [vmem:[#allocation73_spill] sm:$0xff] %v3638_v60  ;;  %v5036_v55 = vld [vmem:[#allocation13_spill] sm:$0xff] }
 0x107   : > { %968 = vperm.xlu1 %3021, %v3434_v56   ;;  %972 = vperm.xlu0 %3020, %v5028_v57  }
 0x109   : > { %v3642_v61 = vpop.permute.xlu1 %589  ;;  %v3644_v52 = vpop.permute.xlu0 %584 }
 0x10a   : > { %5029 = vst [vmem:[#allocation9_spill] sm:$0xff] %v3642_v61  ;;  %5030 = vst [vmem:[#allocation74_spill] sm:$0xff] %v3644_v52  ;;  %v5039_v61 = vld [vmem:[#allocation15_spill] sm:$0xff] }
 0x10b   : > { %976 = vperm.xlu1 %3021, %v5031_v50   ;;  %980 = vperm.xlu0 %3020, %v5032_v59  }
 0x10d   : > { %v3648_v58 = vpop.permute.xlu1 %599  ;;  %v3650_v54 = vpop.permute.xlu0 %594 }
 0x10e   : > { %5033 = vst [vmem:[#allocation11_spill] sm:$0xff] %v3648_v58  ;;  %5034 = vst [vmem:[#allocation75_spill] sm:$0xff] %v3650_v54  ;;  %v4949_v54 = vmov 2  }
 0x10f   : > { %984 = vperm.xlu1 %3021, %v5035_v48   ;;  %988 = vperm.xlu0 %3020, %v5036_v55  }
 0x111   : > { %v3654_v60 = vpop.permute.xlu1 %609  ;;  %v3656_v56 = vpop.permute.xlu0 %604 }
 0x112   : > { %5037 = vst [vmem:[#allocation14_spill] sm:$0xff] %v3654_v60  ;;  %5038 = vst [vmem:[#allocation13_spill] sm:$0xff] %v3656_v56 }
 0x113   : > { %992 = vperm.xlu1 %3021, %v3458_v62   ;;  %996 = vperm.xlu0 %3020, %v5039_v61  }
 0x116   : > { %v3660_v52 = vpop.permute.xlu1 %756  ;;  %v3662_v50 = vpop.permute.xlu0 %752 }
 0x117   : > { %1000 = vperm.xlu1 %3021, %v3466_v0   ;;  %1004 = vperm.xlu0 %3020, %v3463_v63  }
 0x11a   : > { %v3666_v58 = vpop.permute.xlu1 %760  ;;  %v3668_v48 = vpop.permute.xlu0 %764 }
 0x11b   : > { %5040 = vst [vmem:[#allocation15_spill] sm:$0xff] %v3668_v48  ;;  %3022 = vset.pattern.permute.xlu1 %v4949_v54  ;;  %3023 = vset.pattern.permute.xlu0 %v4949_v54 }
 0x11c   : > { %1141 = vperm.xlu1 %3022, %v3218_v2   ;;  %1145 = vperm.xlu0 %3023, %v3226_v4  }
 0x11e   : > { %v3674_v62 = vpop.permute.xlu1 %768  ;;  %v3676_v60 = vpop.permute.xlu0 %772 }
 0x11f   : > { %5041 = vst [vmem:[#allocation76_spill] sm:$0xff] %v3674_v62  ;;  %5042 = vst [vmem:[#allocation77_spill] sm:$0xff] %v3676_v60 }
 0x120   : > { %1149 = vperm.xlu1 %3022, %v3215_v1   ;;  %1157 = vperm.xlu0 %3023, %v3234_v6  }
 0x122   : > { %v3680_v0 = vpop.permute.xlu1 %776  ;;  %v3682_v56 = vpop.permute.xlu0 %780 }
 0x123   : > { %5043 = vst [vmem:[#allocation78_spill] sm:$0xff] %v3680_v0  ;;  %5044 = vst [vmem:[#allocation79_spill] sm:$0xff] %v3682_v56 }
 0x124   : > { %1153 = vperm.xlu1 %3022, %v3223_v3   ;;  %1165 = vperm.xlu0 %3023, %v3242_v8  }
 0x126   : > { %v3686_v54 = vpop.permute.xlu1 %784  ;;  %v3688_v48 = vpop.permute.xlu0 %788 }
 0x127   : > { %5045 = vst [vmem:[#allocation80_spill] sm:$0xff] %v3686_v54  ;;  %5046 = vst [vmem:[#allocation81_spill] sm:$0xff] %v3688_v48 }
 0x128   : > { %1161 = vperm.xlu1 %3022, %v3231_v5   ;;  %1173 = vperm.xlu0 %3023, %v3250_v10  }
 0x12a   : > { %v3692_v60 = vpop.permute.xlu1 %792  ;;  %v3694_v62 = vpop.permute.xlu0 %796 }
 0x12b   : > { %5047 = vst [vmem:[#allocation82_spill] sm:$0xff] %v3692_v60  ;;  %5048 = vst [vmem:[#allocation83_spill] sm:$0xff] %v3694_v62 }
 0x12c   : > { %1169 = vperm.xlu1 %3022, %v3239_v7   ;;  %1181 = vperm.xlu0 %3023, %v3258_v12  }
 0x12e   : > { %v3698_v56 = vpop.permute.xlu1 %800  ;;  %v3700_v0 = vpop.permute.xlu0 %804 }
 0x12f   : > { %5049 = vst [vmem:[#allocation84_spill] sm:$0xff] %v3698_v56  ;;  %5050 = vst [vmem:[#allocation85_spill] sm:$0xff] %v3700_v0 }
 0x130   : > { %1177 = vperm.xlu1 %3022, %v3247_v9   ;;  %1189 = vperm.xlu0 %3023, %v3266_v14  }
 0x132   : > { %v3704_v48 = vpop.permute.xlu1 %808  ;;  %v3706_v54 = vpop.permute.xlu0 %812 }
 0x133   : > { %5051 = vst [vmem:[#allocation86_spill] sm:$0xff] %v3704_v48  ;;  %5052 = vst [vmem:[#allocation87_spill] sm:$0xff] %v3706_v54 }
 0x134   : > { %1185 = vperm.xlu1 %3022, %v3255_v11   ;;  %1197 = vperm.xlu0 %3023, %v3274_v16  }
 0x136   : > { %v3710_v62 = vpop.permute.xlu1 %816  ;;  %v3712_v60 = vpop.permute.xlu0 %820 }
 0x137   : > { %5053 = vst [vmem:[#allocation88_spill] sm:$0xff] %v3710_v62  ;;  %5054 = vst [vmem:[#allocation89_spill] sm:$0xff] %v3712_v60 }
 0x138   : > { %1193 = vperm.xlu1 %3022, %v3263_v13   ;;  %1205 = vperm.xlu0 %3023, %v3282_v18  }
 0x13a   : > { %v3716_v0 = vpop.permute.xlu1 %824  ;;  %v3718_v56 = vpop.permute.xlu0 %828 }
 0x13b   : > { %5055 = vst [vmem:[#allocation90_spill] sm:$0xff] %v3716_v0  ;;  %5056 = vst [vmem:[#allocation91_spill] sm:$0xff] %v3718_v56 }
 0x13c   : > { %1201 = vperm.xlu1 %3022, %v3271_v15   ;;  %1213 = vperm.xlu0 %3023, %v3290_v20  }
 0x13e   : > { %v3722_v54 = vpop.permute.xlu1 %832  ;;  %v3724_v48 = vpop.permute.xlu0 %836 }
 0x13f   : > { %5057 = vst [vmem:[#allocation92_spill] sm:$0xff] %v3722_v54  ;;  %5058 = vst [vmem:[#allocation93_spill] sm:$0xff] %v3724_v48 }
 0x140   : > { %1209 = vperm.xlu1 %3022, %v3279_v17   ;;  %1221 = vperm.xlu0 %3023, %v3298_v22  }
 0x142   : > { %v3728_v60 = vpop.permute.xlu1 %840  ;;  %v3730_v62 = vpop.permute.xlu0 %844 }
 0x143   : > { %5059 = vst [vmem:[#allocation94_spill] sm:$0xff] %v3728_v60  ;;  %5060 = vst [vmem:[#allocation95_spill] sm:$0xff] %v3730_v62 }
 0x144   : > { %1217 = vperm.xlu1 %3022, %v3287_v19   ;;  %1229 = vperm.xlu0 %3023, %v3306_v24  }
 0x146   : > { %v3734_v0 = vpop.permute.xlu1 %848  ;;  %v3736_v56 = vpop.permute.xlu0 %852 }
 0x147   : > { %5061 = vst [vmem:[#allocation96_spill] sm:$0xff] %v3734_v0  ;;  %5062 = vst [vmem:[#allocation97_spill] sm:$0xff] %v3736_v56 }
 0x148   : > { %1225 = vperm.xlu1 %3022, %v3295_v21   ;;  %1237 = vperm.xlu0 %3023, %v3314_v26  }
 0x14a   : > { %v3740_v54 = vpop.permute.xlu1 %856  ;;  %v3742_v48 = vpop.permute.xlu0 %860 }
 0x14b   : > { %5063 = vst [vmem:[#allocation98_spill] sm:$0xff] %v3740_v54  ;;  %5064 = vst [vmem:[#allocation99_spill] sm:$0xff] %v3742_v48 }
 0x14c   : > { %1233 = vperm.xlu1 %3022, %v3303_v23   ;;  %1245 = vperm.xlu0 %3023, %v3322_v28  }
 0x14e   : > { %v3746_v60 = vpop.permute.xlu1 %864  ;;  %v3748_v62 = vpop.permute.xlu0 %868 }
 0x14f   : > { %5065 = vst [vmem:[#allocation100_spill] sm:$0xff] %v3746_v60  ;;  %5066 = vst [vmem:[#allocation101_spill] sm:$0xff] %v3748_v62 }
 0x150   : > { %1241 = vperm.xlu1 %3022, %v3311_v25   ;;  %1253 = vperm.xlu0 %3023, %v3330_v30  }
 0x152   : > { %v3752_v0 = vpop.permute.xlu1 %872  ;;  %v3754_v56 = vpop.permute.xlu0 %876 }
 0x153   : > { %5067 = vst [vmem:[#allocation102_spill] sm:$0xff] %v3752_v0  ;;  %5068 = vst [vmem:[#allocation103_spill] sm:$0xff] %v3754_v56 }
 0x154   : > { %1249 = vperm.xlu1 %3022, %v3319_v27   ;;  %1261 = vperm.xlu0 %3023, %v3338_v32  }
 0x156   : > { %v3758_v26 = vpop.permute.xlu1 %880  ;;  %v3760_v54 = vpop.permute.xlu0 %884 }
 0x158   : > { %1257 = vperm.xlu1 %3022, %v3327_v29   ;;  %1269 = vperm.xlu0 %3023, %v3346_v34  }
 0x15a   : > { %v3764_v28 = vpop.permute.xlu1 %888  ;;  %v3766_v60 = vpop.permute.xlu0 %892 }
 0x15b   : > { %5069 = vst [vmem:[#allocation104_spill] sm:$0xff] %v3766_v60  ;;  %v4951_v60 = vmov 3  }
 0x15c   : > { %1265 = vperm.xlu1 %3022, %v3335_v31   ;;  %1277 = vperm.xlu0 %3023, %v3354_v36  }
 0x15e   : > { %v3770_v30 = vpop.permute.xlu1 %896  ;;  %v3772_v0 = vpop.permute.xlu0 %900 }
 0x15f   : > { %5070 = vst [vmem:[#allocation105_spill] sm:$0xff] %v3770_v30  ;;  %5071 = vst [vmem:[#allocation106_spill] sm:$0xff] %v3772_v0 }
 0x160   : > { %1273 = vperm.xlu1 %3022, %v3343_v33   ;;  %1285 = vperm.xlu0 %3023, %v3362_v38  }
 0x162   : > { %v3776_v32 = vpop.permute.xlu1 %904  ;;  %v3778_v56 = vpop.permute.xlu0 %908 }
 0x163   : > { %5072 = vst [vmem:[#allocation107_spill] sm:$0xff] %v3776_v32  ;;  %5073 = vst [vmem:[#allocation108_spill] sm:$0xff] %v3778_v56 }
 0x164   : > { %1281 = vperm.xlu1 %3022, %v3351_v35   ;;  %1293 = vperm.xlu0 %3023, %v3370_v40  }
 0x166   : > { %v3782_v62 = vpop.permute.xlu1 %912  ;;  %v3784_v48 = vpop.permute.xlu0 %916 }
 0x167   : > { %5074 = vst [vmem:[#allocation109_spill] sm:$0xff] %v3782_v62  ;;  %5075 = vst [vmem:[#allocation110_spill] sm:$0xff] %v3784_v48 }
 0x168   : > { %1289 = vperm.xlu1 %3022, %v3359_v37   ;;  %1301 = vperm.xlu0 %3023, %v3378_v42  }
 0x16a   : > { %v3788_v0 = vpop.permute.xlu1 %920  ;;  %v3790_v30 = vpop.permute.xlu0 %924 }
 0x16b   : > { %5076 = vst [vmem:[#allocation111_spill] sm:$0xff] %v3788_v0  ;;  %5077 = vst [vmem:[#allocation112_spill] sm:$0xff] %v3790_v30 }
 0x16c   : > { %1297 = vperm.xlu1 %3022, %v3367_v39   ;;  %1309 = vperm.xlu0 %3023, %v3386_v44  }
 0x16e   : > { %v3794_v56 = vpop.permute.xlu1 %928  ;;  %v3796_v32 = vpop.permute.xlu0 %932 }
 0x16f   : > { %5078 = vst [vmem:[#allocation113_spill] sm:$0xff] %v3794_v56  ;;  %5079 = vst [vmem:[#allocation114_spill] sm:$0xff] %v3796_v32 }
 0x170   : > { %1305 = vperm.xlu1 %3022, %v3375_v41   ;;  %1317 = vperm.xlu0 %3023, %v3394_v46  }
 0x172   : > { %v3800_v48 = vpop.permute.xlu1 %936  ;;  %v3802_v62 = vpop.permute.xlu0 %940 }
 0x173   : > { %5080 = vst [vmem:[#allocation115_spill] sm:$0xff] %v3800_v48  ;;  %5081 = vst [vmem:[#allocation116_spill] sm:$0xff] %v3802_v62  ;;  %v5160_v48 = vld [vmem:[#allocation28_spill] sm:$0xff] }
 0x174   : > { %1313 = vperm.xlu1 %3022, %v3383_v43   ;;  %1329 = vperm.xlu0 %3023, %v3399_v47  }
 0x176   : > { %v3806_v30 = vpop.permute.xlu1 %944  ;;  %v3808_v0 = vpop.permute.xlu0 %948 }
 0x177   : > { %5082 = vst [vmem:[#allocation117_spill] sm:$0xff] %v3806_v30  ;;  %5083 = vst [vmem:[#allocation118_spill] sm:$0xff] %v3808_v0 }
 0x178   : > { %1321 = vperm.xlu1 %3022, %v3391_v45   ;;  %1337 = vperm.xlu0 %3023, %v3407_v49  }
 0x17a   : > { %v3812_v32 = vpop.permute.xlu1 %952  ;;  %v3814_v56 = vpop.permute.xlu0 %956 }
 0x17b   : > { %5084 = vst [vmem:[#allocation119_spill] sm:$0xff] %v3812_v32  ;;  %5085 = vst [vmem:[#allocation120_spill] sm:$0xff] %v3814_v56 }
 0x17c   : > { %3024 = vset.pattern.permute.xlu1 %v4951_v60  ;;  %1345 = vperm.xlu0 %3023, %v3415_v51  }
 0x17d   : > { %1658 = vperm.xlu1 %3024, %v3346_v34  }
 0x17e   : > { %v3819_v62 = vpop.permute.xlu1 %960  ;;  %v3821_v30 = vpop.permute.xlu0 %964 }
 0x17f   : > { %5086 = vst [vmem:[#allocation121_spill] sm:$0xff] %v3819_v62  ;;  %5087 = vst [vmem:[#allocation122_spill] sm:$0xff] %v3821_v30 }
 0x180   : > { %1353 = vperm.xlu0 %3023, %v3423_v53  }
 0x181   : > { %1534 = vperm.xlu1 %3024, %v3226_v4  }
 0x182   : > { %v3825_v0 = vpop.permute.xlu1 %968  ;;  %v3827_v32 = vpop.permute.xlu0 %972 }
 0x183   : > { %5088 = vst [vmem:[#allocation123_spill] sm:$0xff] %v3825_v0  ;;  %5089 = vst [vmem:[#allocation124_spill] sm:$0xff] %v3827_v32 }
 0x184   : > { %1361 = vperm.xlu0 %3023, %v5028_v57  }
 0x185   : > { %1538 = vperm.xlu1 %3024, %v3215_v1  }
 0x186   : > { %v3831_v60 = vpop.permute.xlu1 %976  ;;  %v3833_v56 = vpop.permute.xlu0 %980 }
 0x187   : > { %5090 = vst [vmem:[#allocation125_spill] sm:$0xff] %v3831_v60  ;;  %5091 = vst [vmem:[#allocation126_spill] sm:$0xff] %v3833_v56 }
 0x188   : > { %1369 = vperm.xlu0 %3023, %v5032_v59  }
 0x189   : > { %1542 = vperm.xlu1 %3024, %v3223_v3   ;;  %v1984_v3 = vld [vmem:[%s4925_s3 + $0x18] sm:$0xff] }
 0x18a   : > { %v3837_v34 = vpop.permute.xlu1 %984  ;;  %v3839_v30 = vpop.permute.xlu0 %988  ;;  %2861 = vmatprep.subr.mxu0 %v1984_v3  ;;  %2965 = vmatprep.subr.mxu1 %v1984_v3 }
 0x18b   : > { %5092 = vst [vmem:[#allocation127_spill] sm:$0xff] %v3837_v34  ;;  %5093 = vst [vmem:[#allocation128_spill] sm:$0xff] %v3839_v30  ;;  %2862 = vmatpush3.msra.mxu0 %v1984_v3  ;;  %2969 = vmatpush3.msra.mxu1 %v1984_v3 }
 0x18c   : > { %1377 = vperm.xlu0 %3023, %v5036_v55   ;;  %v5098_v55 = vmov 3  }
 0x18d   : > { %1546 = vperm.xlu1 %3024, %v3234_v6   ;;  %v1983_v6 = vld [vmem:[%s4925_s3 + $0x10] sm:$0xff] }
 0x18e   : > { %v3843_v4 = vpop.permute.xlu1 %992  ;;  %v3845_v32 = vpop.permute.xlu0 %996  ;;  %2863 = vmatprep.subr.mxu0 %v1983_v6  ;;  %2966 = vmatprep.subr.mxu1 %v1983_v6 }
 0x18f   : > { %5094 = vst [vmem:[#allocation129_spill] sm:$0xff] %v3843_v4  ;;  %5095 = vst [vmem:[#allocation130_spill] sm:$0xff] %v3845_v32  ;;  %2864 = vmatpush3.msra.mxu0 %v1983_v6  ;;  %2970 = vmatpush3.msra.mxu1 %v1983_v6 }
 0x190   : > { %1385 = vperm.xlu0 %3023, %v5039_v61  }
 0x191   : > { %1550 = vperm.xlu1 %3024, %v3231_v5  }
 0x192   : > { %v3849_v1 = vpop.permute.xlu1 %1000  ;;  %v3851_v59 = vpop.permute.xlu0 %1004 }
 0x193   : > { %5096 = vst [vmem:[#allocation131_spill] sm:$0xff] %v3849_v1  ;;  %5097 = vst [vmem:[#allocation132_spill] sm:$0xff] %v3851_v59 }
 0x194   : > { %1393 = vperm.xlu0 %3023, %v3463_v63   ;;  %v1982_v63 = vld [vmem:[%s4925_s3 + $0x8] sm:$0xff] }
 0x195   : > { %1554 = vperm.xlu1 %3024, %v3242_v8   ;;  %2865 = vmatprep.subr.mxu0 %v1982_v63  ;;  %v1981_v8 = vld [vmem:[%s4925_s3] sm:$0xff] }
 0x196   : > { %2866 = vmatpush3.msra.mxu0 %v1982_v63  ;;  %2967 = vmatprep.subr.mxu1 %v1982_v63 }
 0x197   : > { %v3861_v5 = vpop.permute.xlu1 %1141  ;;  %v3863_v61 = vpop.permute.xlu0 %1145  ;;  %2867 = vmatprep.subr.mxu0 %v1981_v8  ;;  %2971 = vmatpush3.msra.mxu1 %v1982_v63 }
 0x198   : > { %3042 = vset.pattern.permute.xlu0 %v5098_v55  ;;  %2868 = vmatpush3.msra.mxu0 %v1981_v8 }
 0x199   : > { %1558 = vperm.xlu1 %3024, %v3239_v7   ;;  %1530 = vperm.xlu0 %3042, %v3218_v2  }
 0x19a   : > { %2968 = vmatprep.subr.mxu1 %v1981_v8 }
 0x19b   : > { %v3874_v59 = vpop.permute.xlu1 %1149  ;;  %v3876_v3 = vpop.permute.xlu0 %1157  ;;  %2972 = vmatpush3.msra.mxu1 %v1981_v8  ;;  %v5107_v8 = vld [vmem:[#allocation5_spill] sm:$0xff] }
 0x19d   : > { %1562 = vperm.xlu1 %3024, %v3250_v10   ;;  %1662 = vperm.xlu0 %3042, %v3343_v33  }
 0x19f   : > { %v3880_v2 = vpop.permute.xlu1 %1153  ;;  %v3882_v7 = vpop.permute.xlu0 %1165 }
 0x1a1   : > { %1566 = vperm.xlu1 %3024, %v3247_v9   ;;  %1666 = vperm.xlu0 %3042, %v3354_v36  }
 0x1a3   : > { %v3886_v1 = vpop.permute.xlu1 %1161  ;;  %v3888_v6 = vpop.permute.xlu0 %1173 }
 0x1a5   : > { %1570 = vperm.xlu1 %3024, %v3258_v12   ;;  %1670 = vperm.xlu0 %3042, %v3351_v35  }
 0x1a7   : > { %v3892_v10 = vpop.permute.xlu1 %1169  ;;  %v3894_v33 = vpop.permute.xlu0 %1181 }
 0x1a8   : > { %5099 = vst [vmem:[#allocation133_spill] sm:$0xff] %v3894_v33 }
 0x1a9   : > { %1574 = vperm.xlu1 %3024, %v3255_v11   ;;  %1674 = vperm.xlu0 %3042, %v3362_v38   ;;  %v5106_v38 = vmov 2  }
 0x1ab   : > { %v3898_v63 = vpop.permute.xlu1 %1177  ;;  %v3900_v9 = vpop.permute.xlu0 %1189 }
 0x1ac   : > { %5100 = vst [vmem:[#allocation134_spill] sm:$0xff] %v3898_v63  ;;  %5101 = vst [vmem:[#allocation135_spill] sm:$0xff] %v3900_v9  ;;  %v5181_v63 = vld [vmem:[#allocation82_spill] sm:$0xff] }
 0x1ad   : > { %1578 = vperm.xlu1 %3024, %v3266_v14   ;;  %1678 = vperm.xlu0 %3042, %v3359_v37  }
 0x1af   : > { %v3904_v36 = vpop.permute.xlu1 %1185  ;;  %v3906_v12 = vpop.permute.xlu0 %1197 }
 0x1b0   : > { %5102 = vst [vmem:[#allocation136_spill] sm:$0xff] %v3904_v36  ;;  %5103 = vst [vmem:[#allocation137_spill] sm:$0xff] %v3906_v12  ;;  %v5175_v36 = vld [vmem:[#allocation54_spill] sm:$0xff] }
 0x1b1   : > { %1582 = vperm.xlu1 %3024, %v3263_v13   ;;  %1682 = vperm.xlu0 %3042, %v3370_v40  }
 0x1b3   : > { %v3910_v35 = vpop.permute.xlu1 %1193  ;;  %v3912_v11 = vpop.permute.xlu0 %1205 }
 0x1b4   : > { %5104 = vst [vmem:[#allocation138_spill] sm:$0xff] %v3910_v35  ;;  %5105 = vst [vmem:[#allocation139_spill] sm:$0xff] %v3912_v11  ;;  %v5158_v11 = vld [vmem:[#allocation26_spill] sm:$0xff] }
 0x1b5   : > { %3025 = vset.pattern.permute.xlu1 %v5106_v38  ;;  %1686 = vperm.xlu0 %3042, %v3367_v39  }
 0x1b6   : > { %1325 = vperm.xlu1 %3025, %v5107_v8  }
 0x1b7   : > { %v3917_v14 = vpop.permute.xlu1 %1201  ;;  %v3919_v37 = vpop.permute.xlu0 %1213 }
 0x1b8   : > { %5108 = vst [vmem:[#allocation5_spill] sm:$0xff] %v3917_v14  ;;  %5109 = vst [vmem:[#allocation140_spill] sm:$0xff] %v3919_v37  ;;  %v5156_v14 = vld [vmem:[#allocation25_spill] sm:$0xff] }
 0x1b9   : > { %1690 = vperm.xlu0 %3042, %v3378_v42  }
 0x1ba   : > { %3026 = vset.pattern.permute.xlu1 %v5098_v55 }
 0x1bb   : > { %1586 = vperm.xlu1 %3026, %v3274_v16   ;;  %v3924_v13 = vpop.permute.xlu1 %1209  ;;  %v3926_v40 = vpop.permute.xlu0 %1221 }
 0x1bc   : > { %5110 = vst [vmem:[#allocation141_spill] sm:$0xff] %v3924_v13  ;;  %5111 = vst [vmem:[#allocation142_spill] sm:$0xff] %v3926_v40 }
 0x1bd   : > { %1694 = vperm.xlu0 %3042, %v3375_v41  }
 0x1bf   : > { %1714 = vperm.xlu1 %3026, %v5107_v8   ;;  %v3930_v39 = vpop.permute.xlu1 %1217  ;;  %v3932_v32 = vpop.permute.xlu0 %1229  ;;  %v5118_v8 = vld [vmem:[#allocation6_spill] sm:$0xff] }
 0x1c0   : > { %5112 = vst [vmem:[#allocation143_spill] sm:$0xff] %v3930_v39  ;;  %5113 = vst [vmem:[#allocation144_spill] sm:$0xff] %v3932_v32  ;;  %v5152_v39 = vld [vmem:[#allocation21_spill] sm:$0xff] }
 0x1c1   : > { %1698 = vperm.xlu0 %3042, %v3386_v44  }
 0x1c3   : > { %1718 = vperm.xlu1 %3026, %v3399_v47   ;;  %v3936_v42 = vpop.permute.xlu1 %1225  ;;  %v3938_v4 = vpop.permute.xlu0 %1237 }
 0x1c4   : > { %5114 = vst [vmem:[#allocation145_spill] sm:$0xff] %v3936_v42  ;;  %5115 = vst [vmem:[#allocation146_spill] sm:$0xff] %v3938_v4  ;;  %v5145_v42 = vld [vmem:[#allocation10_spill] sm:$0xff] }
 0x1c5   : > { %1702 = vperm.xlu0 %3042, %v3383_v43  }
 0x1c7   : > { %3027 = vset.pattern.permute.xlu1 %v5106_v38  ;;  %v3942_v16 = vpop.permute.xlu1 %1233  ;;  %v3944_v41 = vpop.permute.xlu0 %1245 }
 0x1c8   : > { %5116 = vst [vmem:[#allocation147_spill] sm:$0xff] %v3942_v16  ;;  %5117 = vst [vmem:[#allocation148_spill] sm:$0xff] %v3944_v41  ;;  %1333 = vperm.xlu1 %3027, %v5118_v8  }
 0x1c9   : > { %1706 = vperm.xlu0 %3042, %v3394_v46  }
 0x1cb   : > { %v3948_v30 = vpop.permute.xlu1 %1241  ;;  %v3950_v44 = vpop.permute.xlu0 %1253 }
 0x1cc   : > { %5119 = vst [vmem:[#allocation6_spill] sm:$0xff] %v3948_v30  ;;  %5120 = vst [vmem:[#allocation149_spill] sm:$0xff] %v3950_v44  ;;  %3028 = vset.pattern.permute.xlu1 %v5098_v55 }
 0x1cd   : > { %1594 = vperm.xlu1 %3028, %v3282_v18   ;;  %1710 = vperm.xlu0 %3042, %v3391_v45   ;;  %v5125_v45 = vld [vmem:[#allocation7_spill] sm:$0xff] }
 0x1cf   : > { %v3955_v43 = vpop.permute.xlu1 %1249  ;;  %v3957_v47 = vpop.permute.xlu0 %1261 }
 0x1d0   : > { %5121 = vst [vmem:[#allocation150_spill] sm:$0xff] %v3955_v43  ;;  %5122 = vst [vmem:[#allocation151_spill] sm:$0xff] %v3957_v47 }
 0x1d1   : > { %1722 = vperm.xlu1 %3028, %v5118_v8   ;;  %1590 = vperm.xlu0 %3042, %v3271_v15  }
 0x1d3   : > { %v3961_v34 = vpop.permute.xlu1 %1257  ;;  %v1270_v46 = vpop.permute.xlu0 %1269 }
 0x1d4   : > { %5123 = vst [vmem:[#allocation152_spill] sm:$0xff] %v3961_v34 }
 0x1d5   : > { %1726 = vperm.xlu1 %3028, %v3407_v49   ;;  %1598 = vperm.xlu0 %3042, %v3279_v17  }
 0x1d7   : > { %v3965_v44 = vpop.permute.xlu1 %1265  ;;  %v3967_v18 = vpop.permute.xlu0 %1277 }
 0x1d8   : > { %5124 = vst [vmem:[#allocation153_spill] sm:$0xff] %v3965_v44 }
 0x1d9   : > { %3029 = vset.pattern.permute.xlu1 %v5106_v38  ;;  %1606 = vperm.xlu0 %3042, %v3287_v19  }
 0x1da   : > { %1341 = vperm.xlu1 %3029, %v5125_v45  }
 0x1db   : > { %v3972_v8 = vpop.permute.xlu1 %1273  ;;  %v3974_v15 = vpop.permute.xlu0 %1285 }
 0x1dc   : > { %5126 = vst [vmem:[#allocation7_spill] sm:$0xff] %v3974_v15 }
 0x1dd   : > { %1614 = vperm.xlu0 %3042, %v3295_v21  }
 0x1de   : > { %3030 = vset.pattern.permute.xlu1 %v5098_v55 }
 0x1df   : > { %1602 = vperm.xlu1 %3030, %v3290_v20   ;;  %v3979_v17 = vpop.permute.xlu1 %1281  ;;  %v3981_v49 = vpop.permute.xlu0 %1293 }
 0x1e0   : > { %5127 = vst [vmem:[#allocation154_spill] sm:$0xff] %v3979_v17  ;;  %5128 = vst [vmem:[#allocation155_spill] sm:$0xff] %v3981_v49  ;;  %v5182_v17 = vld [vmem:[#allocation83_spill] sm:$0xff] }
 0x1e1   : > { %1622 = vperm.xlu0 %3042, %v3303_v23  }
 0x1e3   : > { %1730 = vperm.xlu1 %3030, %v5125_v45   ;;  %v3985_v19 = vpop.permute.xlu1 %1289  ;;  %v3987_v47 = vpop.permute.xlu0 %1301  ;;  %v5135_v45 = vld [vmem:[#allocation8_spill] sm:$0xff] }
 0x1e4   : > { %5129 = vst [vmem:[#allocation156_spill] sm:$0xff] %v3985_v19  ;;  %5130 = vst [vmem:[#allocation157_spill] sm:$0xff] %v3987_v47  ;;  %v5172_v19 = vld [vmem:[#allocation77_spill] sm:$0xff] }
 0x1e5   : > { %1630 = vperm.xlu0 %3042, %v3311_v25  }
 0x1e7   : > { %1734 = vperm.xlu1 %3030, %v3415_v51   ;;  %v3991_v21 = vpop.permute.xlu1 %1297  ;;  %v3993_v44 = vpop.permute.xlu0 %1309  ;;  %v4010_v51 = vld [vmem:[%s4923_s1] ss:$0 sm:$0xff] }
 0x1e8   : > { %5131 = vst [vmem:[#allocation158_spill] sm:$0xff] %v3991_v21  ;;  %5132 = vst [vmem:[#allocation159_spill] sm:$0xff] %v3993_v44 }
 0x1e9   : > { %1638 = vperm.xlu0 %3042, %v3319_v27   ;;  %5138 = vst [vmem:[#allocation163_spill] sm:$0xff] %v4010_v51  ;;  %v5139_v27 = vld [vmem:[#allocation49_spill] sm:$0xff] }
 0x1ea   : > { %v648_v41 = vmul.f32 %v4010_v51, %v5139_v27  ;;  %v4031_v27 = vld [vmem:[%s4924_s2] ss:$0 sm:$0xff] }
 0x1eb   : > { %3031 = vset.pattern.permute.xlu1 %v5106_v38  ;;  %v3997_v20 = vpop.permute.xlu1 %1305  ;;  %v3999_v23 = vpop.permute.xlu0 %1317  ;;  %5142 = vst [vmem:[#allocation165_spill] sm:$0xff] %v4031_v27 }
 0x1ec   : > { %5133 = vst [vmem:[#allocation160_spill] sm:$0xff] %v3997_v20  ;;  %5134 = vst [vmem:[#allocation161_spill] sm:$0xff] %v3999_v23  ;;  %1349 = vperm.xlu1 %3031, %v5135_v45   ;;  %v5163_v20 = vld [vmem:[#allocation50_spill] sm:$0xff] }
 0x1ed   : > { %1646 = vperm.xlu0 %3042, %v3327_v29   ;;  %v4020_v29 = vld [vmem:[%s4923_s1 + $0x1] ss:$0 sm:$0xff] }
 0x1ee   : > { %v1043_v43 = vmul.f32 %v4020_v29, %v3758_v26  ;;  %v4044_v26 = vld [vmem:[%s4923_s1 + $0x3] ss:$0 sm:$0xff] }
 0x1ef   : > { %v4003_v34 = vpop.permute.xlu1 %1313  ;;  %v4005_v25 = vpop.permute.xlu0 %1329 }
 0x1f0   : > { %5136 = vst [vmem:[#allocation8_spill] sm:$0xff] %v4003_v34  ;;  %5137 = vst [vmem:[#allocation162_spill] sm:$0xff] %v4005_v25  ;;  %3032 = vset.pattern.permute.xlu1 %v5098_v55  ;;  %v5155_v25 = vld [vmem:[#allocation24_spill] sm:$0xff] }
 0x1f1   : > { %1610 = vperm.xlu1 %3032, %v3298_v22   ;;  %1654 = vperm.xlu0 %3042, %v3335_v31   ;;  %v4036_v22 = vld [vmem:[%s4923_s1 + $0x2] ss:$0 sm:$0xff]  ;;  %v718_v31 = vadd.f32 %v4031_v27, %v648_v41  ;;  %v5162_v34 = vld [vmem:[#allocation48_spill] sm:$0xff] }
 0x1f2   : > { %v1432_v4 = vmul.f32 %v4036_v22, %v1270_v46 }
 0x1f3   : > { %v4024_v56 = vpop.permute.xlu1 %1321  ;;  %v4026_v60 = vpop.permute.xlu0 %1337  ;;  %v1107_v30 = vadd.f32 %v1043_v43, %v718_v31  ;;  %v5146_v43 = vld [vmem:[#allocation16_spill] sm:$0xff] }
 0x1f4   : > { %5140 = vst [vmem:[#allocation49_spill] sm:$0xff] %v4024_v56  ;;  %5141 = vst [vmem:[#allocation164_spill] sm:$0xff] %v4026_v60  ;;  %v618_v31 = vmul.f32 %v4010_v51, %v5146_v43  ;;  %v620_v43 = vmul.f32 %v4010_v51, %v5152_v39  ;;  %v5153_v60 = vld [vmem:[#allocation22_spill] sm:$0xff]  ;;  %v5159_v56 = vld [vmem:[#allocation27_spill] sm:$0xff] }
 0x1f5   : > { %1738 = vperm.xlu1 %3032, %v5135_v45   ;;  %v1496_v16 = vadd.f32 %v1432_v4, %v1107_v30 }
 0x1f7   : > { %v4046_v0 = vpop.permute.xlu0 %1345 }
 0x1f8   : > { %5143 = vst [vmem:[#allocation166_spill] sm:$0xff] %v4046_v0  ;;  %v1659_v32 = vpop.permute.xlu1 %1658  ;;  %v5147_v0 = vld [vmem:[#allocation17_spill] sm:$0xff] }
 0x1f9   : > { %v1821_v62 = vmul.f32 %v4044_v26, %v1659_v32  ;;  %1742 = vperm.xlu1 %3032, %v3423_v53   ;;  %v616_v30 = vmul.f32 %v4010_v51, %v5147_v0  ;;  %v5149_v32 = vld [vmem:[#allocation18_spill] sm:$0xff]  ;;  %v623_v0 = vmul.f32 %v4010_v51, %v5153_v60 }
 0x1fb   : > { %v4050_v40 = vpop.permute.xlu0 %1353  ;;  %v1885_v41 = vadd.f32 %v1821_v62, %v1496_v16  ;;  %v619_v62 = vmul.f32 %v4010_v51, %v5149_v32  ;;  %v5150_v16 = vld [vmem:[#allocation19_spill] sm:$0xff]  ;;  %v688_v32 = vadd.f32 %v4031_v27, %v618_v31  ;;  %v686_v13 = vadd.f32 %v4031_v27, %v616_v30 }
 0x1fc   : > { %5144 = vst [vmem:[#allocation167_spill] sm:$0xff] %v4050_v40  ;;  %v4052_v46 = vpop.permute.xlu1 %1534  ;;  %v5151_v40 = vld [vmem:[#allocation20_spill] sm:$0xff]  ;;  %v626_v31 = vmul.f32 %v4010_v51, %v5159_v56  ;;  %v629_v30 = vmul.f32 %v4010_v51, %v5160_v48  ;;  %v693_v44 = vadd.f32 %v4031_v27, %v623_v0  ;;  %v651_v48 = vmul.f32 %v4010_v51, %v5163_v20  ;;  %v5167_v0 = vld [vmem:[#allocation53_spill] sm:$0xff] }
 0x1fd   : > { %3033 = vset.pattern.permute.xlu1 %v5106_v38  ;;  %v1949_v45 = vmax.f32 %v1885_v41, 0.0  ;;  %v617_v41 = vmul.f32 %v4010_v51, %v5150_v16  ;;  %v621_v37 = vmul.f32 %v4010_v51, %v5151_v40  ;;  %v625_v16 = vmul.f32 %v4010_v51, %v5155_v25 }
 0x1fe   : > { %1357 = vperm.xlu1 %3033, %v5145_v42   ;;  %v624_v40 = vmul.f32 %v4010_v51, %v5156_v14  ;;  %v689_v60 = vadd.f32 %v4031_v27, %v619_v62  ;;  %v649_v62 = vmul.f32 %v4010_v51, %v5162_v34  ;;  %v699_v20 = vadd.f32 %v4031_v27, %v629_v30 }
 0x1ff   : > { %2917 = vmatprep.mubr.msk.f32.mxu1 %vm1992_vm0, %v1949_v45  ;;  %v4061_v53 = vpop.permute.xlu0 %1361  ;;  %v5154_v45 = vld [vmem:[#allocation23_spill] sm:$0xff]  ;;  %v687_v25 = vadd.f32 %v4031_v27, %v617_v41  ;;  %v691_v14 = vadd.f32 %v4031_v27, %v621_v37  ;;  %v695_v12 = vadd.f32 %v4031_v27, %v625_v16  ;;  %v652_v16 = vmul.f32 %v4010_v51, %v5167_v0 }
 0x200   : > { %5148 = vst [vmem:[#allocation10_spill] sm:$0xff] %v4061_v53  ;;  %v4065_v4 = vpop.permute.xlu1 %1538  ;;  %v622_v53 = vmul.f32 %v4010_v51, %v5154_v45  ;;  %v627_v45 = vmul.f32 %v4010_v51, %v5158_v11  ;;  %v690_v11 = vadd.f32 %v4031_v27, %v620_v43  ;;  %v694_v41 = vadd.f32 %v4031_v27, %v624_v40  ;;  %v5164_v37 = vld [vmem:[#allocation51_spill] sm:$0xff] }
 0x201   : > { %v650_v47 = vmul.f32 %v4010_v51, %v5164_v37  ;;  %v4125_v49 = vadd.f32 %v4031_v27, %v649_v62  ;;  %v1011_v30 = vmul.f32 %v4020_v29, %v3662_v50  ;;  %v1013_v0 = vmul.f32 %v4020_v29, %v3666_v58 }
 0x202   : > { %3034 = vset.pattern.permute.xlu1 %v5098_v55  ;;  %v692_v56 = vadd.f32 %v4031_v27, %v622_v53  ;;  %v697_v43 = vadd.f32 %v4031_v27, %v627_v45  ;;  %v696_v53 = vadd.f32 %v4031_v27, %v626_v31  ;;  %v1012_v45 = vmul.f32 %v4020_v29, %v3660_v52 }
 0x203   : > { %1618 = vperm.xlu1 %3034, %v3306_v24   ;;  %v4085_v39 = vpop.permute.xlu0 %1369  ;;  %v5161_v24 = vld [vmem:[#allocation29_spill] sm:$0xff]  ;;  %v4132_v31 = vadd.f32 %v4031_v27, %v651_v48  ;;  %v720_v62 = vadd.f32 %v4031_v27, %v650_v47  ;;  %v1016_v48 = vmul.f32 %v4020_v29, %v5172_v19  ;;  %v4152_v58 = vadd.f32 %v4031_v27, %v652_v16  ;;  %v5177_v47 = vld [vmem:[#allocation78_spill] sm:$0xff] }
 0x204   : > { %5157 = vst [vmem:[#allocation16_spill] sm:$0xff] %v4085_v39  ;;  %v4094_v23 = vpop.permute.xlu1 %1542  ;;  %v628_v39 = vmul.f32 %v4010_v51, %v5161_v24  ;;  %v5165_v24 = vld [vmem:[#allocation52_spill] sm:$0xff] }
 0x205   : > { %v653_v21 = vmul.f32 %v4010_v51, %v5165_v24  ;;  %v5168_v24 = vld [vmem:[#allocation55_spill] sm:$0xff]  ;;  %5174 = vst [vmem:[#allocation20_spill] sm:$0xff] %v4152_v58  ;;  %v5180_v58 = vld [vmem:[#allocation81_spill] sm:$0xff] }
 0x206   : > { %v698_v37 = vadd.f32 %v4031_v27, %v628_v39  ;;  %v1020_v15 = vmul.f32 %v4020_v29, %v5180_v58  ;;  %v1433_v58 = vmul.f32 %v4036_v22, %v3972_v8 }
 0x207   : > { %1746 = vperm.xlu1 %3034, %v5145_v42   ;;  %v4114_v34 = vpop.permute.xlu0 %1377  ;;  %v654_v42 = vmul.f32 %v4010_v51, %v5168_v24  ;;  %v4142_v35 = vadd.f32 %v4031_v27, %v653_v21  ;;  %v5171_v24 = vld [vmem:[#allocation76_spill] sm:$0xff]  ;;  %v1017_v21 = vmul.f32 %v4020_v29, %v5177_v47  ;;  %v1021_v47 = vmul.f32 %v4020_v29, %v5181_v63 }
 0x208   : > { %5166 = vst [vmem:[#allocation17_spill] sm:$0xff] %v4114_v34  ;;  %v4121_v40 = vpop.permute.xlu1 %1546  ;;  %v5169_v34 = vld [vmem:[#allocation15_spill] sm:$0xff]  ;;  %v1015_v52 = vmul.f32 %v4020_v29, %v5171_v24  ;;  %v1401_v63 = vmul.f32 %v4036_v22, %v3863_v61  ;;  %v1045_v61 = vmul.f32 %v4020_v29, %v3764_v28  ;;  %v1404_v28 = vmul.f32 %v4036_v22, %v3876_v3 }
 0x209   : > { %v1014_v39 = vmul.f32 %v4020_v29, %v5169_v34  ;;  %5170 = vst [vmem:[#allocation18_spill] sm:$0xff] %v4142_v35  ;;  %v4156_v34 = vmul.f32 %v4010_v51, %v5175_v36  ;;  %v5178_v35 = vld [vmem:[#allocation79_spill] sm:$0xff]  ;;  %v4165_v19 = vadd.f32 %v4031_v27, %v654_v42  ;;  %v1075_v36 = vadd.f32 %v1011_v30, %v686_v13  ;;  %v5183_v27 = vld [vmem:[#allocation84_spill] sm:$0xff] }
 0x20a   : > { %v1018_v24 = vmul.f32 %v4020_v29, %v5178_v35  ;;  %v1077_v51 = vadd.f32 %v1013_v0, %v688_v32  ;;  %v1079_v33 = vadd.f32 %v1015_v52, %v690_v11  ;;  %v4173_v35 = vadd.f32 %v1016_v48, %v691_v14  ;;  %v5184_v32 = vld [vmem:[#allocation85_spill] sm:$0xff]  ;;  %v5185_v14 = vld [vmem:[#allocation12_spill] sm:$0xff] }
 0x20b   : > { %1750 = vperm.xlu1 %3034, %v5028_v57   ;;  %v4149_v50 = vpop.permute.xlu0 %1385  ;;  %5176 = vst [vmem:[#allocation21_spill] sm:$0xff] %v4156_v34  ;;  %v1076_v57 = vadd.f32 %v1012_v45, %v687_v25  ;;  %v1078_v34 = vadd.f32 %v1014_v39, %v689_v60  ;;  %v1022_v42 = vmul.f32 %v4020_v29, %v5182_v17 }
 0x20c   : > { %5173 = vst [vmem:[#allocation19_spill] sm:$0xff] %v4149_v50  ;;  %v4162_v9 = vpop.permute.xlu1 %1550  ;;  %v5179_v50 = vld [vmem:[#allocation80_spill] sm:$0xff]  ;;  %v1023_v25 = vmul.f32 %v4020_v29, %v5183_v27  ;;  %v4182_v13 = vadd.f32 %v1018_v24, %v693_v44  ;;  %v1024_v60 = vmul.f32 %v4020_v29, %v5184_v32  ;;  %v4191_v30 = vadd.f32 %v1020_v15, %v695_v12 }
 0x20d   : > { %v1019_v16 = vmul.f32 %v4020_v29, %v5179_v50  ;;  %v1081_v50 = vadd.f32 %v1017_v21, %v692_v56  ;;  %v1400_v27 = vmul.f32 %v4036_v22, %v3861_v5  ;;  %v1402_v44 = vmul.f32 %v4036_v22, %v3874_v59  ;;  %v5186_v5 = vld [vmem:[#allocation104_spill] sm:$0xff] }
 0x20e   : > { %v4197_v56 = vadd.f32 %v1021_v47, %v696_v53  ;;  %v1044_v0 = vmul.f32 %v4020_v29, %v3760_v54  ;;  %v4205_v12 = vadd.f32 %v1022_v42, %v697_v43  ;;  %v4207_v15 = vadd.f32 %v1023_v25, %v698_v37 }
 0x20f   : > { %3035 = vset.pattern.permute.xlu1 %v5106_v38  ;;  %v4180_v45 = vpop.permute.xlu0 %1393  ;;  %v4189_v17 = vadd.f32 %v1019_v16, %v694_v41  ;;  %v1790_v41 = vmul.f32 %v4044_v26, %v4052_v46  ;;  %v1046_v39 = vmul.f32 %v4020_v29, %v5186_v5  ;;  %v1791_v59 = vmul.f32 %v4044_v26, %v4065_v4 }
 0x210   : > { %1365 = vperm.xlu1 %3035, %v5185_v14   ;;  %v1555_v11 = vpop.permute.xlu1 %1554  ;;  %v4213_v53 = vadd.f32 %v1024_v60, %v699_v20  ;;  %v1465_v54 = vadd.f32 %v1401_v63, %v1076_v57  ;;  %v1403_v46 = vmul.f32 %v4036_v22, %v3880_v2  ;;  %v1464_v52 = vadd.f32 %v1400_v27, %v1075_v36  ;;  %v3044_v20 = vld [vmem:[%s3212_s9 + $0xc0] sm:$0xff] }
 0x211   : > { %v1466_v48 = vadd.f32 %v1402_v44, %v1077_v51  ;;  %v1108_v21 = vadd.f32 %v1044_v0, %v4125_v49  ;;  %v1109_v24 = vadd.f32 %v1045_v61, %v720_v62  ;;  %v1792_v2 = vmul.f32 %v4044_v26, %v4094_v23  ;;  %v3045_v60 = vld [vmem:[%s3212_s9 + $0x1c0] sm:$0xff] }
 0x212   : > { %v1854_v3 = vadd.f32 %v1790_v41, %v1465_v54  ;;  %v1110_v57 = vadd.f32 %v1046_v39, %v4132_v31  ;;  %v1793_v51 = vmul.f32 %v4044_v26, %v4121_v40  ;;  %v1468_v8 = vadd.f32 %v1404_v28, %v1079_v33  ;;  %v5187_v63 = vld [vmem:[#allocation105_spill] sm:$0xff]  ;;  %v5188_v54 = vld [vmem:[#allocation154_spill] sm:$0xff] }
 0x213   : > { %v1855_v16 = vadd.f32 %v1791_v59, %v1466_v48  ;;  %v1467_v47 = vadd.f32 %v1403_v46, %v1078_v34  ;;  %v1406_v42 = vmul.f32 %v4036_v22, %v3882_v7  ;;  %v1405_v49 = vmul.f32 %v4036_v22, %v3886_v1 }
 0x214   : > { %3036 = vset.pattern.permute.xlu1 %v5098_v55  ;;  %v1559_v43 = vpop.permute.xlu1 %1558  ;;  %v1531_v37 = vpop.permute.xlu0 %1530  ;;  %v1434_v23 = vmul.f32 %v4036_v22, %v3967_v18  ;;  %v1497_v32 = vadd.f32 %v1433_v58, %v1108_v21  ;;  %v1047_v33 = vmul.f32 %v4020_v29, %v5187_v63  ;;  %v1918_v34 = vmax.f32 %v1854_v3, 0.0  ;;  %v5190_v3 = vld [vmem:[#allocation133_spill] sm:$0xff] }
 0x215   : > { %v1789_v4 = vmul.f32 %v4044_v26, %v1531_v37  ;;  %1626 = vperm.xlu1 %3036, %v3044_v20   ;;  %v1856_v14 = vadd.f32 %v1792_v2, %v1467_v47  ;;  %v1794_v7 = vmul.f32 %v4044_v26, %v4162_v9  ;;  %v1919_v1 = vmax.f32 %v1855_v16, 0.0  ;;  %v5191_v16 = vld [vmem:[#allocation134_spill] sm:$0xff] }
 0x216   : > { %v1857_v27 = vadd.f32 %v1793_v51, %v1468_v8  ;;  %v1795_v44 = vmul.f32 %v4044_v26, %v1555_v11  ;;  %v1470_v0 = vadd.f32 %v1406_v42, %v1081_v50  ;;  %v1469_v61 = vadd.f32 %v1405_v49, %v4173_v35  ;;  %v3046_v50 = vld [vmem:[%s3212_s9 + $0x1c8] sm:$0xff]  ;;  %v5192_v8 = vld [vmem:[#allocation7_spill] sm:$0xff] }
 0x217   : > { %v1853_v36 = vadd.f32 %v1789_v4, %v1464_v52  ;;  %v1408_v41 = vmul.f32 %v4036_v22, %v3888_v6  ;;  %v1407_v5 = vmul.f32 %v4036_v22, %v3892_v10  ;;  %v1498_v59 = vadd.f32 %v1434_v23, %v1109_v24  ;;  %v5189_v35 = vld [vmem:[#allocation106_spill] sm:$0xff] }
 0x218   : > { %v1563_v62 = vpop.permute.xlu1 %1562  ;;  %v1663_v25 = vpop.permute.xlu0 %1662  ;;  %v1435_v11 = vmul.f32 %v4036_v22, %v5188_v54  ;;  %v1048_v6 = vmul.f32 %v4020_v29, %v5189_v35  ;;  %v1920_v37 = vmax.f32 %v1856_v14, 0.0  ;;  %v1858_v10 = vadd.f32 %v1794_v7, %v1469_v61  ;;  %v5194_v7 = vld [vmem:[#allocation135_spill] sm:$0xff]  ;;  %v5196_v61 = vld [vmem:[#allocation156_spill] sm:$0xff] }
 0x219   : > { %v1822_v31 = vmul.f32 %v4044_v26, %v1663_v25  ;;  %1754 = vperm.xlu1 %3036, %v3045_v60   ;;  %v1917_v40 = vmax.f32 %v1853_v36, 0.0  ;;  %v1796_v52 = vmul.f32 %v4044_v26, %v1559_v43  ;;  %v1921_v48 = vmax.f32 %v1857_v27, 0.0 }
 0x21a   : > { %v1859_v58 = vadd.f32 %v1795_v44, %v1470_v0  ;;  %v1797_v4 = vmul.f32 %v4044_v26, %v1563_v62  ;;  %v1472_v21 = vadd.f32 %v1408_v41, %v4189_v17  ;;  %v1471_v24 = vadd.f32 %v1407_v5, %v4182_v13  ;;  %v5193_v13 = vld [vmem:[#allocation20_spill] sm:$0xff] }
 0x21b   : > { %v1886_v18 = vadd.f32 %v1822_v31, %v1497_v32  ;;  %2869 = vmatprep.mubr.msk.f32.mxu0 %vm1992_vm0, %v1917_v40  ;;  %v1410_v2 = vmul.f32 %v4036_v22, %v5190_v3  ;;  %v1409_v51 = vmul.f32 %v4036_v22, %v5191_v16  ;;  %v1436_v47 = vmul.f32 %v4036_v22, %v5192_v8  ;;  %v3047_v31 = vld [vmem:[%s3212_s9 + $0x1d0] sm:$0xff] }
 0x21c   : > { %v1567_v39 = vpop.permute.xlu1 %1566  ;;  %2870 = vmatmul.mubr.msk.f32.vlgmr.msra.gmra.mxu0 %vm1992_vm0, %v1918_v34  ;;  %v1667_v9 = vpop.permute.xlu0 %1666  ;;  %v1499_v42 = vadd.f32 %v1435_v11, %v1110_v57  ;;  %v1111_v62 = vadd.f32 %v1047_v33, %v5193_v13  ;;  %v1922_v25 = vmax.f32 %v1858_v10, 0.0  ;;  %v1860_v23 = vadd.f32 %v1796_v52, %v1471_v24  ;;  %v5198_v11 = vld [vmem:[#allocation18_spill] sm:$0xff] }
 0x21d   : > { %v1950_v28 = vmax.f32 %v1886_v18, 0.0  ;;  %v1823_v46 = vmul.f32 %v4044_v26, %v1667_v9  ;;  %1758 = vperm.xlu1 %3036, %v3046_v50   ;;  %2872 = vmatprep.mubr.msk.f32.mxu0 %vm1992_vm0, %v1919_v1  ;;  %v1798_v32 = vmul.f32 %v4044_v26, %v1567_v39  ;;  %v1923_v60 = vmax.f32 %v1859_v58, 0.0  ;;  %v5195_v1 = vld [vmem:[#allocation136_spill] sm:$0xff] }
 0x21e   : > { %v1861_v40 = vadd.f32 %v1797_v4, %v1472_v21  ;;  %v1474_v34 = vadd.f32 %v1410_v2, %v4197_v56  ;;  %v1473_v14 = vadd.f32 %v1409_v51, %v4191_v30  ;;  %v1412_v33 = vmul.f32 %v4036_v22, %v5194_v7  ;;  %v5197_v30 = vld [vmem:[#allocation107_spill] sm:$0xff] }
 0x21f   : > { %v1887_v20 = vadd.f32 %v1823_v46, %v1498_v59  ;;  %2918 = vmatmul.mubr.msk.f32.vlgmr.msra.gmra.mxu1 %vm1992_vm0, %v1950_v28  ;;  %v1411_v27 = vmul.f32 %v4036_v22, %v5195_v1  ;;  %v1500_v0 = vadd.f32 %v1436_v47, %v1111_v62  ;;  %v1437_v41 = vmul.f32 %v4036_v22, %v5196_v61  ;;  %v5200_v4 = vld [vmem:[#allocation155_spill] sm:$0xff]  ;;  %v5204_v62 = vld [vmem:[#allocation57_spill] sm:$0xff] }
 0x220   : > { %v1571_v36 = vpop.permute.xlu1 %1570  ;;  %2873 = vmatmul.mubr.msk.f32.gmra.mxu0 %vm1992_vm0, %v1920_v37  ;;  %v1671_v43 = vpop.permute.xlu0 %1670  ;;  %v1049_v39 = vmul.f32 %v4020_v29, %v5197_v30  ;;  %v1924_v9 = vmax.f32 %v1860_v23, 0.0  ;;  %v1862_v59 = vadd.f32 %v1798_v32, %v1473_v14  ;;  %v1112_v28 = vadd.f32 %v1048_v6, %v5198_v11  ;;  %v3048_v37 = vld [vmem:[%s3212_s9 + $0xd0] sm:$0xff] }
 0x221   : > { %v1951_v49 = vmax.f32 %v1887_v20, 0.0  ;;  %v1824_v17 = vmul.f32 %v4044_v26, %v1671_v43  ;;  %3037 = vset.pattern.permute.xlu1 %v5106_v38  ;;  %2875 = vmatprep.mubr.msk.f32.mxu0 %vm1992_vm0, %v1921_v48  ;;  %v1799_v63 = vmul.f32 %v4044_v26, %v1571_v36  ;;  %v1925_v46 = vmax.f32 %v1861_v40, 0.0  ;;  %v5199_v48 = vld [vmem:[#allocation138_spill] sm:$0xff]  ;;  %v5207_v7 = vld [vmem:[#allocation31_spill] sm:$0xff] }
 0x222   : > { %1373 = vperm.xlu1 %3037, %v3047_v31   ;;  %v1476_v10 = vadd.f32 %v1412_v33, %v4207_v15  ;;  %v1475_v52 = vadd.f32 %v1411_v27, %v4205_v12  ;;  %v1413_v58 = vmul.f32 %v4036_v22, %v5199_v48  ;;  %v1438_v20 = vmul.f32 %v4036_v22, %v5200_v4  ;;  %v5201_v15 = vld [vmem:[#allocation108_spill] sm:$0xff]  ;;  %v5208_v27 = vld [vmem:[#allocation109_spill] sm:$0xff] }
 0x223   : > { %v1888_v57 = vadd.f32 %v1824_v17, %v1499_v42  ;;  %2920 = vmatprep.mubr.msk.f32.mxu1 %vm1992_vm0, %v1951_v49  ;;  %v1863_v50 = vadd.f32 %v1799_v63, %v1474_v34  ;;  %v1501_v24 = vadd.f32 %v1437_v41, %v1112_v28  ;;  %v1113_v12 = vadd.f32 %v1049_v39, %v4165_v19  ;;  %v5202_v49 = vld [vmem:[#allocation21_spill] sm:$0xff]  ;;  %v5206_v63 = vld [vmem:[#allocation158_spill] sm:$0xff]  ;;  %v3049_v41 = vld [vmem:[%s3212_s9 + $0x1d8] sm:$0xff] }
 0x224   : > { %v1575_v44 = vpop.permute.xlu1 %1574  ;;  %2876 = vmatmul.mubr.msk.f32.gmra.mxu0 %vm1992_vm0, %v1922_v25  ;;  %v1675_v18 = vpop.permute.xlu0 %1674  ;;  %v1050_v51 = vmul.f32 %v4020_v29, %v5201_v15  ;;  %v1926_v36 = vmax.f32 %v1862_v59, 0.0  ;;  %v5203_v17 = vld [vmem:[#allocation165_spill] sm:$0xff]  ;;  %v5205_v25 = vld [vmem:[#allocation163_spill] sm:$0xff]  ;;  %v1477_v32 = vadd.f32 %v1413_v58, %v4213_v53  ;;  %v5210_v39 = vld [vmem:[#allocation86_spill] sm:$0xff] }
 0x225   : > { %v1952_v5 = vmax.f32 %v1888_v57, 0.0  ;;  %v1825_v56 = vmul.f32 %v4044_v26, %v1675_v18  ;;  %2878 = vmatprep.mubr.msk.f32.mxu0 %vm1992_vm0, %v1923_v60  ;;  %v1800_v54 = vmul.f32 %v4044_v26, %v1575_v44  ;;  %v1927_v8 = vmax.f32 %v1863_v50, 0.0  ;;  %v5211_v59 = vld [vmem:[#allocation157_spill] sm:$0xff] }
 0x226   : > { %3038 = vset.pattern.permute.xlu1 %v5098_v55  ;;  %v725_v13 = vadd.f32 %v5203_v17, %v5202_v49  ;;  %v656_v23 = vmul.f32 %v5205_v25, %v5204_v62  ;;  %v1502_v19 = vadd.f32 %v1438_v20, %v1113_v12  ;;  %v1439_v57 = vmul.f32 %v4036_v22, %v5206_v63  ;;  %v5213_v4 = vld [vmem:[#allocation137_spill] sm:$0xff]  ;;  %v5216_v49 = vld [vmem:[#allocation111_spill] sm:$0xff] }
 0x227   : > { %v1889_v35 = vadd.f32 %v1825_v56, %v1500_v0  ;;  %1634 = vperm.xlu1 %3038, %v3048_v37   ;;  %2921 = vmatmul.mubr.msk.f32.gmra.mxu1 %vm1992_vm0, %v1952_v5  ;;  %v1864_v43 = vadd.f32 %v1800_v54, %v1475_v52  ;;  %v630_v33 = vmul.f32 %v5205_v25, %v5207_v7  ;;  %v5209_v5 = vld [vmem:[#allocation56_spill] sm:$0xff]  ;;  %v5212_v52 = vld [vmem:[#allocation110_spill] sm:$0xff] }
 0x228   : > { %v1579_v21 = vpop.permute.xlu1 %1578  ;;  %2879 = vmatmul.mubr.msk.f32.gmra.mxu0 %vm1992_vm0, %v1924_v9  ;;  %v1679_v6 = vpop.permute.xlu0 %1678  ;;  %v1114_v53 = vadd.f32 %v1050_v51, %v725_v13  ;;  %v1051_v44 = vmul.f32 %v4020_v29, %v5208_v27  ;;  %v657_v56 = vmul.f32 %v5205_v25, %v5209_v5  ;;  %v726_v30 = vadd.f32 %v5203_v17, %v656_v23  ;;  %v5215_v51 = vld [vmem:[#allocation160_spill] sm:$0xff]  ;;  %v3051_v27 = vld [vmem:[%s3212_s9 + $0xe0] sm:$0xff] }
 0x229   : > { %v1953_v3 = vmax.f32 %v1889_v35, 0.0  ;;  %v1801_v2 = vmul.f32 %v4044_v26, %v1579_v21  ;;  %v1826_v16 = vmul.f32 %v4044_v26, %v1679_v6  ;;  %2881 = vmatprep.mubr.msk.f32.mxu0 %vm1992_vm0, %v1925_v46  ;;  %v1928_v1 = vmax.f32 %v1864_v43, 0.0 }
 0x22a   : > { %v1025_v9 = vmul.f32 %v4020_v29, %v5210_v39  ;;  %v1440_v54 = vmul.f32 %v4036_v22, %v5211_v59  ;;  %v1503_v28 = vadd.f32 %v1439_v57, %v1114_v53  ;;  %v1052_v48 = vmul.f32 %v4020_v29, %v5212_v52  ;;  %v5223_v39 = vld [vmem:[#allocation112_spill] sm:$0xff] }
 0x22b   : > { %v1865_v47 = vadd.f32 %v1801_v2, %v1476_v10  ;;  %v1890_v42 = vadd.f32 %v1826_v16, %v1501_v24  ;;  %1762 = vperm.xlu1 %3038, %v3047_v31   ;;  %2923 = vmatprep.mubr.msk.f32.mxu1 %vm1992_vm0, %v1953_v3  ;;  %v700_v10 = vadd.f32 %v5203_v17, %v630_v33  ;;  %v5214_v24 = vld [vmem:[#allocation59_spill] sm:$0xff]  ;;  %v3050_v16 = vld [vmem:[%s3212_s9 + $0x1e0] sm:$0xff] }
 0x22c   : > { %v1583_v60 = vpop.permute.xlu1 %1582  ;;  %2882 = vmatmul.mubr.msk.f32.gmra.mxu0 %vm1992_vm0, %v1926_v36  ;;  %v1683_v40 = vpop.permute.xlu0 %1682  ;;  %v1115_v58 = vadd.f32 %v1051_v44, %v726_v30  ;;  %v1414_v20 = vmul.f32 %v4036_v22, %v5213_v4  ;;  %v727_v6 = vadd.f32 %v5203_v17, %v657_v56  ;;  %v658_v3 = vmul.f32 %v5205_v25, %v5214_v24  ;;  %v5220_v44 = vld [vmem:[#allocation32_spill] sm:$0xff] }
 0x22d   : > { %v1954_v31 = vmax.f32 %v1890_v42, 0.0  ;;  %v1802_v34 = vmul.f32 %v4044_v26, %v1583_v60  ;;  %v1827_v14 = vmul.f32 %v4044_v26, %v1683_v40  ;;  %2884 = vmatprep.mubr.msk.f32.mxu0 %vm1992_vm0, %v1927_v8  ;;  %v1929_v18 = vmax.f32 %v1865_v47, 0.0  ;;  %v5218_v40 = vld [vmem:[#allocation58_spill] sm:$0xff] }
 0x22e   : > { %v1089_v2 = vadd.f32 %v1025_v9, %v700_v10  ;;  %v1504_v15 = vadd.f32 %v1440_v54, %v1115_v58  ;;  %v1441_v36 = vmul.f32 %v4036_v22, %v5215_v51  ;;  %v1116_v47 = vadd.f32 %v1052_v48, %v727_v6  ;;  %v5226_v58 = vld [vmem:[#allocation8_spill] sm:$0xff] }
 0x22f   : > { %v1866_v0 = vadd.f32 %v1802_v34, %v1477_v32  ;;  %v1891_v61 = vadd.f32 %v1827_v14, %v1502_v19  ;;  %1766 = vperm.xlu1 %3038, %v3049_v41   ;;  %2924 = vmatmul.mubr.msk.f32.gmra.mxu1 %vm1992_vm0, %v1954_v31  ;;  %v1053_v13 = vmul.f32 %v4020_v29, %v5216_v49  ;;  %v5217_v19 = vld [vmem:[#allocation30_spill] sm:$0xff]  ;;  %v5219_v31 = vld [vmem:[#allocation159_spill] sm:$0xff]  ;;  %v5222_v41 = vld [vmem:[#allocation60_spill] sm:$0xff] }
 0x230   : > { %2885 = vmatmul.mubr.msk.f32.gmra.mxu0 %vm1992_vm0, %v1928_v1  ;;  %v1687_v11 = vpop.permute.xlu0 %1686  ;;  %v1478_v62 = vadd.f32 %v1414_v20, %v1089_v2  ;;  %v631_v60 = vmul.f32 %v5205_v25, %v5217_v19  ;;  %v659_v63 = vmul.f32 %v5205_v25, %v5218_v40  ;;  %v728_v57 = vadd.f32 %v5203_v17, %v658_v3  ;;  %v5227_v2 = vld [vmem:[#allocation63_spill] sm:$0xff]  ;;  %v5228_v51 = vld [vmem:[#allocation64_spill] sm:$0xff] }
 0x231   : > { %v1930_v46 = vmax.f32 %v1866_v0, 0.0  ;;  %v1955_v50 = vmax.f32 %v1891_v61, 0.0  ;;  %v1828_v35 = vmul.f32 %v4044_v26, %v1687_v11  ;;  %v4335_v37 = vpop.permute.xlu1 %1325  ;;  %2887 = vmatprep.mubr.msk.f32.mxu0 %vm1992_vm0, %v1929_v18  ;;  %v1442_v34 = vmul.f32 %v4036_v22, %v5219_v31  ;;  %v5221_v0 = vld [vmem:[#allocation33_spill] sm:$0xff] }
 0x232   : > { %v1505_v7 = vadd.f32 %v1441_v36, %v1116_v47  ;;  %v633_v18 = vmul.f32 %v5205_v25, %v5220_v44  ;;  %v632_v61 = vmul.f32 %v5205_v25, %v5221_v0  ;;  %v661_v5 = vmul.f32 %v5205_v25, %v5222_v41 }
 0x233   : > { %v1892_v21 = vadd.f32 %v1828_v35, %v1503_v28  ;;  %3039 = vset.pattern.permute.xlu1 %v5106_v38  ;;  %2926 = vmatprep.mubr.msk.f32.mxu1 %vm1992_vm0, %v1955_v50  ;;  %v1117_v30 = vadd.f32 %v1053_v13, %v728_v57  ;;  %v1054_v9 = vmul.f32 %v4020_v29, %v5223_v39  ;;  %v5225_v35 = vld [vmem:[#allocation62_spill] sm:$0xff]  ;;  %v5230_v13 = vld [vmem:[#allocation65_spill] sm:$0xff] }
 0x234   : > { %1381 = vperm.xlu1 %3039, %v3050_v16   ;;  %2888 = vmatmul.mubr.msk.f32.gmra.mxu0 %vm1992_vm0, %v1930_v46  ;;  %v1691_v12 = vpop.permute.xlu0 %1690  ;;  %v701_v11 = vadd.f32 %v5203_v17, %v631_v60  ;;  %v729_v28 = vadd.f32 %v5203_v17, %v659_v63  ;;  %v5224_v46 = vld [vmem:[#allocation61_spill] sm:$0xff]  ;;  %v663_v10 = vmul.f32 %v5205_v25, %v5225_v35 }
 0x235   : > { %v1956_v43 = vmax.f32 %v1892_v21, 0.0  ;;  %v1829_v8 = vmul.f32 %v4044_v26, %v1691_v12  ;;  %v660_v50 = vmul.f32 %v5205_v25, %v5224_v46  ;;  %v1506_v48 = vadd.f32 %v1442_v34, %v1117_v30  ;;  %v5232_v60 = vld [vmem:[#allocation161_spill] sm:$0xff]  ;;  %v3052_v34 = vld [vmem:[%s3212_s9 + $0x1e8] sm:$0xff] }
 0x236   : > { %v1587_v42 = vpop.permute.xlu1 %1586  ;;  %v1443_v4 = vmul.f32 %v4036_v22, %v5226_v58  ;;  %v703_v6 = vadd.f32 %v5203_v17, %v633_v18  ;;  %v702_v24 = vadd.f32 %v5203_v17, %v632_v61  ;;  %v731_v3 = vadd.f32 %v5203_v17, %v661_v5  ;;  %v5236_v61 = vld [vmem:[#allocation114_spill] sm:$0xff]  ;;  %v5238_v35 = vld [vmem:[#allocation49_spill] sm:$0xff] }
 0x237   : > { %v1893_v23 = vadd.f32 %v1829_v8, %v1504_v15  ;;  %v1803_v32 = vmul.f32 %v4044_v26, %v1587_v42  ;;  %2927 = vmatmul.mubr.msk.f32.gmra.mxu1 %vm1992_vm0, %v1956_v43  ;;  %v662_v12 = vmul.f32 %v5205_v25, %v5227_v2  ;;  %v665_v36 = vmul.f32 %v5205_v25, %v5228_v51  ;;  %v5229_v8 = vld [vmem:[#allocation113_spill] sm:$0xff]  ;;  %v5240_v51 = vld [vmem:[#allocation139_spill] sm:$0xff] }
 0x238   : > { %3040 = vset.pattern.permute.xlu1 %v5098_v55  ;;  %v1695_v14 = vpop.permute.xlu0 %1694  ;;  %v1118_v43 = vadd.f32 %v1054_v9, %v729_v28  ;;  %v730_v42 = vadd.f32 %v5203_v17, %v660_v50  ;;  %v733_v49 = vadd.f32 %v5203_v17, %v663_v10  ;;  %v1444_v40 = vmul.f32 %v4036_v22, %v5232_v60 }
 0x239   : > { %v1957_v33 = vmax.f32 %v1893_v23, 0.0  ;;  %v1867_v53 = vadd.f32 %v1803_v32, %v1478_v62  ;;  %v1830_v1 = vmul.f32 %v4044_v26, %v1695_v14  ;;  %1642 = vperm.xlu1 %3040, %v3051_v27   ;;  %v664_v62 = vmul.f32 %v5205_v25, %v5230_v13  ;;  %v5231_v23 = vld [vmem:[#allocation87_spill] sm:$0xff] }
 0x23a   : > { %v1715_v56 = vpop.permute.xlu1 %1714  ;;  %v1026_v32 = vmul.f32 %v4020_v29, %v5231_v23  ;;  %v1507_v63 = vadd.f32 %v1443_v4, %v1118_v43  ;;  %v732_v14 = vadd.f32 %v5203_v17, %v662_v12  ;;  %v5235_v27 = vld [vmem:[#allocation115_spill] sm:$0xff]  ;;  %v735_v18 = vadd.f32 %v5203_v17, %v665_v36  ;;  %v5239_v12 = vld [vmem:[#allocation117_spill] sm:$0xff] }
 0x23b   : > { %v1931_v59 = vmax.f32 %v1867_v53, 0.0  ;;  %v1894_v54 = vadd.f32 %v1830_v1, %v1505_v7  ;;  %2929 = vmatprep.mubr.msk.f32.mxu1 %vm1992_vm0, %v1957_v33  ;;  %v5233_v7 = vld [vmem:[#allocation88_spill] sm:$0xff]  ;;  %v5234_v53 = vld [vmem:[#allocation89_spill] sm:$0xff]  ;;  %v1057_v44 = vmul.f32 %v4020_v29, %v5235_v27  ;;  %v1056_v41 = vmul.f32 %v4020_v29, %v5236_v61 }
 0x23c   : > { %v1699_v52 = vpop.permute.xlu0 %1698  ;;  %v1027_v33 = vmul.f32 %v4020_v29, %v5233_v7  ;;  %v1028_v1 = vmul.f32 %v4020_v29, %v5234_v53  ;;  %v734_v39 = vadd.f32 %v5203_v17, %v664_v62  ;;  %v1090_v9 = vadd.f32 %v1026_v32, %v701_v11  ;;  %v5243_v32 = vld [vmem:[#allocation118_spill] sm:$0xff]  ;;  %v5244_v7 = vld [vmem:[#allocation141_spill] sm:$0xff] }
 0x23d   : > { %v1958_v20 = vmax.f32 %v1894_v54, 0.0  ;;  %v1831_v21 = vmul.f32 %v4044_v26, %v1699_v52  ;;  %1770 = vperm.xlu1 %3040, %v3050_v16   ;;  %2890 = vmatprep.mubr.msk.f32.mxu0 %vm1992_vm0, %v1931_v59  ;;  %v1055_v16 = vmul.f32 %v4020_v29, %v5229_v8  ;;  %v5237_v59 = vld [vmem:[#allocation116_spill] sm:$0xff]  ;;  %v1446_v28 = vmul.f32 %v4036_v22, %v4335_v37 }
 0x23e   : > { %v1719_v15 = vpop.permute.xlu1 %1718  ;;  %v1058_v54 = vmul.f32 %v4020_v29, %v5237_v59  ;;  %v1445_v10 = vmul.f32 %v4036_v22, %v5238_v35  ;;  %v1091_v58 = vadd.f32 %v1027_v33, %v702_v24  ;;  %v1092_v4 = vadd.f32 %v1028_v1, %v703_v6  ;;  %v5242_v6 = vld [vmem:[#allocation162_spill] sm:$0xff]  ;;  %v5245_v1 = vld [vmem:[#allocation164_spill] sm:$0xff] }
 0x23f   : > { %v1895_v47 = vadd.f32 %v1831_v21, %v1506_v48  ;;  %2930 = vmatmul.mubr.msk.f32.gmra.mxu1 %vm1992_vm0, %v1958_v20  ;;  %v1119_v0 = vadd.f32 %v1055_v16, %v730_v42  ;;  %v1121_v20 = vadd.f32 %v1057_v44, %v732_v14  ;;  %v1835_v11 = vmul.f32 %v4044_v26, %v1715_v56  ;;  %v3053_v21 = vld [vmem:[%s3212_s9 + $0x1f0] sm:$0xff]  ;;  %v5241_v16 = vld [vmem:[#allocation5_spill] sm:$0xff] }
 0x240   : > { %v1703_v19 = vpop.permute.xlu0 %1702  ;;  %v1120_v2 = vadd.f32 %v1056_v41, %v731_v3  ;;  %v1059_v37 = vmul.f32 %v4020_v29, %v5239_v12  ;;  %v1416_v36 = vmul.f32 %v4036_v22, %v5240_v51  ;;  %v1122_v8 = vadd.f32 %v1058_v54, %v733_v49  ;;  %v3055_v51 = vld [vmem:[%s3212_s9 + $0x1f8] sm:$0xff] }
 0x241   : > { %v1959_v57 = vmax.f32 %v1895_v47, 0.0  ;;  %v1832_v31 = vmul.f32 %v4044_v26, %v1703_v19  ;;  %1774 = vperm.xlu1 %3040, %v3052_v34   ;;  %v1508_v50 = vadd.f32 %v1444_v40, %v1119_v0  ;;  %v1447_v24 = vmul.f32 %v4036_v22, %v5242_v6  ;;  %v3054_v34 = vld [vmem:[%s3212_s9 + $0xf0] sm:$0xff]  ;;  %s2648_s9 = sshll.u32 %s4742_s11, 4  ;;  %s4875_s9 = int_to_ptr.vmem [resolvable:$true] %s2648_s9 }
 0x242   : > { %v1510_v56 = vadd.f32 %v1446_v28, %v1121_v20  ;;  %v1509_v42 = vadd.f32 %v1445_v10, %v1120_v2  ;;  %v1060_v19 = vmul.f32 %v4020_v29, %v5243_v32  ;;  %v1836_v60 = vmul.f32 %v4044_v26, %v1719_v15  ;;  %v5247_v2 = vld [vmem:[#allocation35_spill] sm:$0xff]  ;;  %v5252_v32 = vld [vmem:[#allocation140_spill] sm:$0xff]  ;;  %s3061_s16 = scalar_lea.vmem %s4875_s9, 8192  ;;  %p3068_p0 = scmp.lt.s32.totalorder %s4875_s9, %s3066_s23 }
 0x243   : > { %v1896_v5 = vadd.f32 %v1832_v31, %v1507_v63  ;;  %v1334_v30 = vpop.permute.xlu1 %1333  ;;  %2932 = vmatprep.mubr.msk.f32.mxu1 %vm1992_vm0, %v1959_v57  ;;  %v1123_v63 = vadd.f32 %v1059_v37, %v734_v39  ;;  %v1480_v57 = vadd.f32 %v1416_v36, %v1091_v58  ;;  %v1417_v33 = vmul.f32 %v4036_v22, %v5244_v7  ;;  %v5246_v58 = vld [vmem:[#allocation34_spill] sm:$0xff]  ;;  %v5248_v36 = vld [vmem:[#allocation91_spill] sm:$0xff]  ;;  %p3062_p11 = scmp.ne.s32.totalorder %s4875_s9, %s3061_s16  ;;  %p3069_p1 = scmp.lt.s32.totalorder %s3067_s25, %s3061_s16 }
 0x244   : > { %v1707_v46 = vpop.permute.xlu0 %1706  ;;  %v1448_v13 = vmul.f32 %v4036_v22, %v1334_v30  ;;  %v1899_v49 = vadd.f32 %v1835_v11, %v1510_v56  ;;  %v1511_v53 = vadd.f32 %v1447_v24, %v1122_v8  ;;  %v1449_v27 = vmul.f32 %v4036_v22, %v5245_v1  ;;  %v5249_v8 = vld [vmem:[#allocation90_spill] sm:$0xff] }
 0x245   : > { %v1960_v52 = vmax.f32 %v1896_v5, 0.0  ;;  %v1833_v48 = vmul.f32 %v4044_v26, %v1707_v46  ;;  %3041 = vset.pattern.permute.xlu1 %v5106_v38  ;;  %v1415_v38 = vmul.f32 %v4036_v22, %v5241_v16  ;;  %v1124_v5 = vadd.f32 %v1060_v19, %v735_v18  ;;  %p3063_p12 = pnand %p3062_p11, %p3198_p5  ;;  %p3070_p2 = por %p3069_p1, %p3068_p0 }
 0x246   : > { %1389 = vperm.xlu1 %3041, %v3053_v21   ;;  %v1512_v0 = vadd.f32 %v1448_v13, %v1123_v63  ;;  %v1963_v30 = vmax.f32 %v1899_v49, 0.0  ;;  %v1900_v39 = vadd.f32 %v1836_v60, %v1511_v53  ;;  %v1481_v28 = vadd.f32 %v1417_v33, %v1092_v4  ;;  %v5253_v63 = vld [vmem:[#allocation119_spill] sm:$0xff] }
 0x247   : > { %v1897_v43 = vadd.f32 %v1833_v48, %v1508_v50  ;;  %2933 = vmatmul.mubr.msk.f32.gmra.mxu1 %vm1992_vm0, %v1960_v52  ;;  %v1479_v14 = vadd.f32 %v1415_v38, %v1090_v9  ;;  %v1513_v46 = vadd.f32 %v1449_v27, %v1124_v5  ;;  %v635_v20 = vmul.f32 %v5205_v25, %v5246_v58  ;;  %p3064_p13 = pneg %p3063_p12 }
 0x248   : > { %v1595_v47 = vpop.permute.xlu1 %1594  ;;  %v1711_v3 = vpop.permute.xlu0 %1710  ;;  %v1964_v11 = vmax.f32 %v1900_v39, 0.0  ;;  %v634_v12 = vmul.f32 %v5205_v25, %v5247_v2  ;;  %v1029_v16 = vmul.f32 %v4020_v29, %v5249_v8  ;;  %v1418_v19 = vmul.f32 %v4036_v22, %v5252_v32  ;;  %v5259_v2 = vld [vmem:[#allocation93_spill] sm:$0xff] }
 0x249   : > { %v1961_v62 = vmax.f32 %v1897_v43, 0.0  ;;  %v1834_v23 = vmul.f32 %v4044_v26, %v1711_v3  ;;  %v1805_v40 = vmul.f32 %v4044_v26, %v1595_v47  ;;  %v1030_v43 = vmul.f32 %v4020_v29, %v5248_v36  ;;  %v5250_v3 = vld [vmem:[#allocation143_spill] sm:$0xff]  ;;  %p3071_p3 = pnand %p3070_p2, %p3064_p13 }
 0x24a   : > { %3043 = vset.pattern.permute.xlu1 %v5098_v55  ;;  %v705_v47 = vadd.f32 %v5203_v17, %v635_v20  ;;  %v704_v13 = vadd.f32 %v5203_v17, %v634_v12  ;;  %v5258_v20 = vld [vmem:[#allocation37_spill] sm:$0xff]  ;;  %v1032_v12 = vmul.f32 %v4020_v29, %v5259_v2 }
 0x24b   : > { %v1898_v31 = vadd.f32 %v1834_v23, %v1509_v42  ;;  %1650 = vperm.xlu1 %3043, %v3054_v34   ;;  %2935 = vmatprep.mubr.msk.f32.mxu1 %vm1992_vm0, %v1961_v62  ;;  %v1869_v59 = vadd.f32 %v1805_v40, %v1480_v57  ;;  %v1419_v42 = vmul.f32 %v4036_v22, %v5250_v3  ;;  %v5251_v62 = vld [vmem:[#allocation67_spill] sm:$0xff] }
 0x24c   : > { %v1723_v15 = vpop.permute.xlu1 %1722  ;;  %v1591_v44 = vpop.permute.xlu0 %1590  ;;  %v666_v23 = vmul.f32 %v5205_v25, %v5251_v62  ;;  %v1094_v49 = vadd.f32 %v1030_v43, %v705_v47  ;;  %v1093_v40 = vadd.f32 %v1029_v16, %v704_v13  ;;  %v1061_v57 = vmul.f32 %v4020_v29, %v5253_v63  ;;  %v5261_v16 = vld [vmem:[#allocation145_spill] sm:$0xff]  ;;  %v5263_v47 = vld [vmem:[#allocation142_spill] sm:$0xff] }
 0x24d   : > { %v1962_v61 = vmax.f32 %v1898_v31, 0.0  ;;  %v1837_v55 = vmul.f32 %v4044_v26, %v1723_v15  ;;  %v1804_v41 = vmul.f32 %v4044_v26, %v1591_v44  ;;  %v5254_v31 = vld [vmem:[#allocation66_spill] sm:$0xff]  ;;  %v1420_v3 = vmul.f32 %v4036_v22, %v5263_v47 }
 0x24e   : > { %v667_v34 = vmul.f32 %v5205_v25, %v5254_v31  ;;  %v736_v33 = vadd.f32 %v5203_v17, %v666_v23  ;;  %v1482_v53 = vadd.f32 %v1418_v19, %v1093_v40  ;;  %v5264_v23 = vld [vmem:[#allocation121_spill] sm:$0xff]  ;;  %v5265_v19 = vld [vmem:[#allocation68_spill] sm:$0xff] }
 0x24f   : > { %v1901_v9 = vadd.f32 %v1837_v55, %v1512_v0  ;;  %v1868_v54 = vadd.f32 %v1804_v41, %v1479_v14  ;;  %1778 = vperm.xlu1 %3043, %v3053_v21   ;;  %2936 = vmatmul.mubr.msk.f32.gmra.mxu1 %vm1992_vm0, %v1962_v61  ;;  %v1933_v21 = vmax.f32 %v1869_v59, 0.0  ;;  %v1483_v14 = vadd.f32 %v1419_v42, %v1094_v49  ;;  %v5255_v0 = vld [vmem:[#allocation120_spill] sm:$0xff] }
 0x250   : > { %v1727_v50 = vpop.permute.xlu1 %1726  ;;  %2938 = vmatprep.mubr.msk.f32.mxu1 %vm1992_vm0, %v1963_v30  ;;  %v1599_v35 = vpop.permute.xlu0 %1598  ;;  %v1125_v44 = vadd.f32 %v1061_v57, %v736_v33  ;;  %v1062_v61 = vmul.f32 %v4020_v29, %v5255_v0  ;;  %v737_v41 = vadd.f32 %v5203_v17, %v667_v34  ;;  %v5256_v30 = vld [vmem:[#allocation166_spill] sm:$0xff]  ;;  %v1063_v32 = vmul.f32 %v4020_v29, %v5264_v23  ;;  %v4525_v33 = vld [vmem:[%s4923_s1 + $0x1] ss:$0 sm:$0xff] }
 0x251   : > { %v1965_v10 = vmax.f32 %v1901_v9, 0.0  ;;  %v1932_v52 = vmax.f32 %v1868_v54, 0.0  ;;  %v1838_v48 = vmul.f32 %v4044_v26, %v1727_v50  ;;  %v1806_v18 = vmul.f32 %v4044_v26, %v1599_v35 }
 0x252   : > { %v1451_v39 = vmul.f32 %v4036_v22, %v5256_v30  ;;  %v669_v49 = vmul.f32 %v5205_v25, %v5265_v19 }
 0x253   : > { %v1902_v4 = vadd.f32 %v1838_v48, %v1513_v46  ;;  %v1870_v37 = vadd.f32 %v1806_v18, %v1481_v28  ;;  %1782 = vperm.xlu1 %3043, %v3055_v51   ;;  %2891 = vmatmul.mubr.msk.f32.gmra.mxu0 %vm1992_vm0, %v1932_v52  ;;  %v1126_v46 = vadd.f32 %v1062_v61, %v737_v41  ;;  %v5257_v18 = vld [vmem:[#allocation36_spill] sm:$0xff] }
 0x254   : > { %2939 = vmatmul.mubr.msk.f32.gmra.mxu1 %vm1992_vm0, %v1964_v11  ;;  %2893 = vmatprep.mubr.msk.f32.mxu0 %vm1992_vm0, %v1933_v21  ;;  %v1607_v24 = vpop.permute.xlu0 %1606  ;;  %v637_v58 = vmul.f32 %v5205_v25, %v5257_v18  ;;  %v636_v11 = vmul.f32 %v5205_v25, %v5258_v20 }
 0x255   : > { %v1966_v38 = vmax.f32 %v1902_v4, 0.0  ;;  %v1934_v6 = vmax.f32 %v1870_v37, 0.0  ;;  %2941 = vmatprep.mubr.msk.f32.mxu1 %vm1992_vm0, %v1965_v10  ;;  %v1342_v56 = vpop.permute.xlu1 %1341  ;;  %v1808_v60 = vmul.f32 %v4044_v26, %v1607_v24  ;;  %v1515_v10 = vadd.f32 %v1451_v39, %v1126_v46  ;;  %v5260_v4 = vld [vmem:[#allocation92_spill] sm:$0xff]  ;;  %v5262_v24 = vld [vmem:[#allocation69_spill] sm:$0xff]  ;;  %v5269_v46 = vld [vmem:[#allocation39_spill] sm:$0xff] }
 0x256   : > { %v1450_v1 = vmul.f32 %v4036_v22, %v1342_v56  ;;  %v1031_v37 = vmul.f32 %v4020_v29, %v5260_v4  ;;  %v707_v8 = vadd.f32 %v5203_v17, %v637_v58  ;;  %v668_v56 = vmul.f32 %v5205_v25, %v5262_v24  ;;  %v5266_v29 = vld [vmem:[#allocation122_spill] sm:$0xff]  ;;  %v5272_v4 = vld [vmem:[#allocation147_spill] sm:$0xff] }
 0x257   : > { %2894 = vmatmul.mubr.msk.f32.gmra.mxu0 %vm1992_vm0, %v1934_v6  ;;  %v1872_v15 = vadd.f32 %v1808_v60, %v1483_v14  ;;  %v706_v6 = vadd.f32 %v5203_v17, %v636_v11 }
 0x258   : > { %2942 = vmatmul.mubr.msk.f32.gmra.mxu1 %vm1992_vm0, %v1966_v38  ;;  %v1514_v59 = vadd.f32 %v1450_v1, %v1125_v44  ;;  %v1615_v51 = vpop.permute.xlu0 %1614  ;;  %v1421_v38 = vmul.f32 %v4036_v22, %v5261_v16  ;;  %v1096_v42 = vadd.f32 %v1032_v12, %v707_v8  ;;  %v738_v63 = vadd.f32 %v5203_v17, %v668_v56  ;;  %v4564_v12 = vld [vmem:[%s4923_s1 + $0x2] ss:$0 sm:$0xff]  ;;  %v5274_v8 = vld [vmem:[#allocation144_spill] sm:$0xff]  ;;  %v5275_v56 = vld [vmem:[#allocation123_spill] sm:$0xff] }
 0x259   : > { %v1936_v28 = vmax.f32 %v1872_v15, 0.0  ;;  %v1810_v13 = vmul.f32 %v4044_v26, %v1615_v51  ;;  %v1095_v62 = vadd.f32 %v1031_v37, %v706_v6  ;;  %v739_v1 = vadd.f32 %v5203_v17, %v669_v49  ;;  %v5267_v15 = vld [vmem:[#allocation167_spill] sm:$0xff]  ;;  %v4538_v17 = vld [vmem:[%s4923_s1 + $0x3] ss:$0 sm:$0xff] }
 0x25a   : > { %v1603_v7 = vpop.permute.xlu1 %1602  ;;  %v1485_v60 = vadd.f32 %v1421_v38, %v1096_v42  ;;  %v1453_v44 = vmul.f32 %v4036_v22, %v5267_v15  ;;  %v1423_v37 = vmul.f32 %v4564_v12, %v5272_v4  ;;  %v1422_v16 = vmul.f32 %v4564_v12, %v5274_v8 }
 0x25b   : > { %v1807_v27 = vmul.f32 %v4044_v26, %v1603_v7  ;;  %v1484_v57 = vadd.f32 %v1420_v3, %v1095_v62  ;;  %v1127_v7 = vadd.f32 %v1063_v32, %v738_v63  ;;  %v1065_v47 = vmul.f32 %v4525_v33, %v5275_v56  ;;  %v5276_v3 = vld [vmem:[#allocation70_spill] sm:$0xff]  ;;  %v5277_v63 = vld [vmem:[#allocation124_spill] sm:$0xff] }
 0x25c   : > { %v1874_v14 = vadd.f32 %v1810_v13, %v1485_v60  ;;  %v1623_v58 = vpop.permute.xlu0 %1622 }
 0x25d   : > { %v1871_v55 = vadd.f32 %v1807_v27, %v1482_v53  ;;  %v1064_v53 = vmul.f32 %v4525_v33, %v5266_v29  ;;  %v1812_v6 = vmul.f32 %v4538_v17, %v1623_v58 }
 0x25e   : > { %v1731_v5 = vpop.permute.xlu1 %1730  ;;  %v1938_v41 = vmax.f32 %v1874_v14, 0.0 }
 0x25f   : > { %v1935_v9 = vmax.f32 %v1871_v55, 0.0  ;;  %v1839_v54 = vmul.f32 %v4044_v26, %v1731_v5  ;;  %v1128_v5 = vadd.f32 %v1064_v53, %v739_v1 }
 0x261   : > { %v1903_v50 = vadd.f32 %v1839_v54, %v1514_v59  ;;  %2896 = vmatprep.mubr.msk.f32.mxu0 %vm1992_vm0, %v1935_v9  ;;  %v1517_v59 = vadd.f32 %v1453_v44, %v1128_v5  ;;  %v5268_v54 = vld [vmem:[#allocation38_spill] sm:$0xff]  ;;  %v5279_v5 = vld [vmem:[#allocation40_spill] sm:$0xff] }
 0x262   : > { %v1735_v35 = vpop.permute.xlu1 %1734  ;;  %2897 = vmatmul.mubr.msk.f32.gmra.mxu0 %vm1992_vm0, %v1936_v28 }
 0x263   : > { %v1967_v52 = vmax.f32 %v1903_v50, 0.0  ;;  %v1840_v48 = vmul.f32 %v4044_v26, %v1735_v35 }
 0x265   : > { %v1904_v21 = vadd.f32 %v1840_v48, %v1515_v10  ;;  %2944 = vmatprep.mubr.msk.f32.mxu1 %vm1992_vm0, %v1967_v52  ;;  %v5270_v10 = vld [vmem:[#allocation95_spill] sm:$0xff]  ;;  %v5271_v48 = vld [vmem:[#allocation94_spill] sm:$0xff] }
 0x266   : > { %v1034_v52 = vmul.f32 %v4525_v33, %v5270_v10  ;;  %v1033_v18 = vmul.f32 %v4525_v33, %v5271_v48  ;;  %v5283_v48 = vld [vmem:[#allocation6_spill] sm:$0xff] }
 0x267   : > { %v1968_v36 = vmax.f32 %v1904_v21, 0.0  ;;  %v1350_v43 = vpop.permute.xlu1 %1349  ;;  %v4558_v21 = vld [vmem:[%s4924_s2] ss:$0 sm:$0xff] }
 0x268   : > { %v1452_v31 = vmul.f32 %v4036_v22, %v1350_v43 }
 0x269   : > { %2945 = vmatmul.mubr.msk.f32.gmra.mxu1 %vm1992_vm0, %v1968_v36  ;;  %v5273_v36 = vld [vmem:[#allocation71_spill] sm:$0xff] }
 0x26a   : > { %v1516_v0 = vadd.f32 %v1452_v31, %v1127_v7  ;;  %v5278_v7 = vld [vmem:[#allocation10_spill] sm:$0xff] }
 0x26b   : > { %v1455_v29 = vmul.f32 %v4564_v12, %v5278_v7 }
 0x26c   : > { %v1611_v40 = vpop.permute.xlu1 %1610 }
 0x26d   : > { %v1809_v34 = vmul.f32 %v4044_v26, %v1611_v40 }
 0x26f   : > { %v1873_v25 = vadd.f32 %v1809_v34, %v1484_v57  ;;  %v1066_v57 = vmul.f32 %v4525_v33, %v5277_v63 }
 0x270   : > { %v1739_v27 = vpop.permute.xlu1 %1738 }
 0x271   : > { %v1937_v61 = vmax.f32 %v1873_v25, 0.0  ;;  %v1841_v55 = vmul.f32 %v4044_v26, %v1739_v27  ;;  %v4544_v26 = vld [vmem:[%s4923_s1] ss:$0 sm:$0xff] }
 0x272   : > { %v639_v28 = vmul.f32 %v4544_v26, %v5268_v54  ;;  %v638_v50 = vmul.f32 %v4544_v26, %v5269_v46  ;;  %v670_v43 = vmul.f32 %v4544_v26, %v5273_v36  ;;  %v671_v42 = vmul.f32 %v4544_v26, %v5276_v3 }
 0x273   : > { %v1905_v30 = vadd.f32 %v1841_v55, %v1516_v0  ;;  %2899 = vmatprep.mubr.msk.f32.mxu0 %vm1992_vm0, %v1937_v61 }
 0x274   : > { %v1743_v39 = vpop.permute.xlu1 %1742  ;;  %2900 = vmatmul.mubr.msk.f32.gmra.mxu0 %vm1992_vm0, %v1938_v41  ;;  %v709_v2 = vadd.f32 %v4558_v21, %v639_v28  ;;  %v708_v51 = vadd.f32 %v4558_v21, %v638_v50  ;;  %v740_v23 = vadd.f32 %v4558_v21, %v670_v43  ;;  %v741_v34 = vadd.f32 %v4558_v21, %v671_v42  ;;  %v5282_v28 = vld [vmem:[#allocation96_spill] sm:$0xff]  ;;  %v1631_v50 = vpop.permute.xlu0 %1630  ;;  %v5286_v43 = vld [vmem:[#allocation125_spill] sm:$0xff] }
 0x275   : > { %v1969_v9 = vmax.f32 %v1905_v30, 0.0  ;;  %v1842_v22 = vmul.f32 %v4538_v17, %v1743_v39  ;;  %v641_v30 = vmul.f32 %v4544_v26, %v5279_v5  ;;  %v5280_v39 = vld [vmem:[#allocation41_spill] sm:$0xff]  ;;  %v1035_v46 = vmul.f32 %v4525_v33, %v5282_v28  ;;  %v5294_v28 = vld [vmem:[#allocation150_spill] sm:$0xff] }
 0x276   : > { %v1098_v38 = vadd.f32 %v1034_v52, %v709_v2  ;;  %v1097_v24 = vadd.f32 %v1033_v18, %v708_v51  ;;  %v1129_v40 = vadd.f32 %v1065_v47, %v740_v23  ;;  %v1130_v15 = vadd.f32 %v1066_v57, %v741_v34  ;;  %v5285_v2 = vld [vmem:[#allocation146_spill] sm:$0xff] }
 0x277   : > { %v1906_v35 = vadd.f32 %v1842_v22, %v1517_v59  ;;  %2947 = vmatprep.mubr.msk.f32.mxu1 %vm1992_vm0, %v1969_v9  ;;  %v640_v59 = vmul.f32 %v4544_v26, %v5280_v39  ;;  %v5281_v22 = vld [vmem:[#allocation97_spill] sm:$0xff]  ;;  %v711_v52 = vadd.f32 %v4558_v21, %v641_v30  ;;  %v1425_v18 = vmul.f32 %v4564_v12, %v5283_v48  ;;  %v5288_v23 = vld [vmem:[#allocation126_spill] sm:$0xff] }
 0x278   : > { %v1487_v13 = vadd.f32 %v1423_v37, %v1098_v38  ;;  %v1486_v32 = vadd.f32 %v1422_v16, %v1097_v24  ;;  %v1519_v61 = vadd.f32 %v1455_v29, %v1130_v15  ;;  %v1036_v54 = vmul.f32 %v4525_v33, %v5281_v22  ;;  %v5287_v16 = vld [vmem:[#allocation72_spill] sm:$0xff]  ;;  %v5290_v15 = vld [vmem:[#allocation42_spill] sm:$0xff] }
 0x279   : > { %v1970_v20 = vmax.f32 %v1906_v35, 0.0  ;;  %v1358_v11 = vpop.permute.xlu1 %1357  ;;  %v710_v58 = vadd.f32 %v4558_v21, %v640_v59  ;;  %v1424_v4 = vmul.f32 %v4564_v12, %v5285_v2  ;;  %v1814_v51 = vmul.f32 %v4538_v17, %v1631_v50  ;;  %v5293_v30 = vld [vmem:[#allocation98_spill] sm:$0xff]  ;;  %v1639_v59 = vpop.permute.xlu0 %1638 }
 0x27a   : > { %v1454_v19 = vmul.f32 %v4564_v12, %v1358_v11  ;;  %v1876_v60 = vadd.f32 %v1812_v6, %v1487_v13  ;;  %v1100_v37 = vadd.f32 %v1036_v54, %v711_v52  ;;  %v1067_v8 = vmul.f32 %v4525_v33, %v5286_v43  ;;  %v5296_v52 = vld [vmem:[#allocation148_spill] sm:$0xff] }
 0x27b   : > { %2948 = vmatmul.mubr.msk.f32.gmra.mxu1 %vm1992_vm0, %v1970_v20  ;;  %v5284_v20 = vld [vmem:[#allocation73_spill] sm:$0xff]  ;;  %v1099_v36 = vadd.f32 %v1035_v46, %v710_v58  ;;  %v673_v38 = vmul.f32 %v4544_v26, %v5287_v16  ;;  %v1037_v39 = vmul.f32 %v4525_v33, %v5293_v30  ;;  %v1427_v46 = vmul.f32 %v4564_v12, %v5294_v28  ;;  %v5305_v30 = vld [vmem:[#allocation152_spill] sm:$0xff] }
 0x27c   : > { %v1518_v53 = vadd.f32 %v1454_v19, %v1129_v40  ;;  %v1940_v27 = vmax.f32 %v1876_v60, 0.0  ;;  %v672_v11 = vmul.f32 %v4544_v26, %v5284_v20  ;;  %v1489_v6 = vadd.f32 %v1425_v18, %v1100_v37  ;;  %v5289_v40 = vld [vmem:[#allocation16_spill] sm:$0xff] }
 0x27d   : > { %v1488_v47 = vadd.f32 %v1424_v4, %v1099_v36  ;;  %v1457_v63 = vmul.f32 %v4564_v12, %v5289_v40  ;;  %v1426_v48 = vmul.f32 %v4564_v12, %v5296_v52  ;;  %v1816_v58 = vmul.f32 %v4538_v17, %v1639_v59  ;;  %v5298_v4 = vld [vmem:[#allocation9_spill] sm:$0xff] }
 0x27e   : > { %v1619_v62 = vpop.permute.xlu1 %1618  ;;  %v742_v56 = vadd.f32 %v4558_v21, %v672_v11  ;;  %v1878_v13 = vadd.f32 %v1814_v51, %v1489_v6  ;;  %v5297_v11 = vld [vmem:[#allocation127_spill] sm:$0xff]  ;;  %v675_v37 = vmul.f32 %v4544_v26, %v5298_v4 }
 0x27f   : > { %v1811_v49 = vmul.f32 %v4538_v17, %v1619_v62  ;;  %v1069_v2 = vmul.f32 %v4525_v33, %v5297_v11 }
 0x280   : > { %v1131_v62 = vadd.f32 %v1067_v8, %v742_v56  ;;  %v5299_v56 = vld [vmem:[#allocation128_spill] sm:$0xff] }
 0x281   : > { %v1875_v31 = vadd.f32 %v1811_v49, %v1486_v32  ;;  %v1068_v32 = vmul.f32 %v4525_v33, %v5288_v23  ;;  %v743_v49 = vadd.f32 %v4558_v21, %v673_v38 }
 0x282   : > { %v1747_v14 = vpop.permute.xlu1 %1746 }
 0x283   : > { %v1939_v25 = vmax.f32 %v1875_v31, 0.0  ;;  %v1843_v1 = vmul.f32 %v4538_v17, %v1747_v14  ;;  %v1942_v14 = vmax.f32 %v1878_v13, 0.0  ;;  %v1132_v7 = vadd.f32 %v1068_v32, %v743_v49 }
 0x285   : > { %v1907_v44 = vadd.f32 %v1843_v1, %v1518_v53  ;;  %2902 = vmatprep.mubr.msk.f32.mxu0 %vm1992_vm0, %v1939_v25  ;;  %v1521_v25 = vadd.f32 %v1457_v63, %v1132_v7  ;;  %v5301_v7 = vld [vmem:[#allocation44_spill] sm:$0xff] }
 0x286   : > { %v1751_v0 = vpop.permute.xlu1 %1750  ;;  %2903 = vmatmul.mubr.msk.f32.gmra.mxu0 %vm1992_vm0, %v1940_v27 }
 0x287   : > { %v1971_v55 = vmax.f32 %v1907_v44, 0.0  ;;  %v1844_v41 = vmul.f32 %v4538_v17, %v1751_v0  ;;  %v643_v44 = vmul.f32 %v4544_v26, %v5290_v15  ;;  %v5291_v0 = vld [vmem:[#allocation43_spill] sm:$0xff] }
 0x289   : > { %v1908_v9 = vadd.f32 %v1844_v41, %v1519_v61  ;;  %2950 = vmatprep.mubr.msk.f32.mxu1 %vm1992_vm0, %v1971_v55  ;;  %v642_v61 = vmul.f32 %v4544_v26, %v5291_v0  ;;  %v5292_v41 = vld [vmem:[#allocation99_spill] sm:$0xff]  ;;  %v713_v54 = vadd.f32 %v4558_v21, %v643_v44  ;;  %v5304_v44 = vld [vmem:[#allocation100_spill] sm:$0xff] }
 0x28a   : > { %v1038_v5 = vmul.f32 %v4525_v33, %v5292_v41  ;;  %v1039_v0 = vmul.f32 %v4525_v33, %v5304_v44  ;;  %v5316_v44 = vld [vmem:[#allocation153_spill] sm:$0xff] }
 0x28b   : > { %v1972_v35 = vmax.f32 %v1908_v9, 0.0  ;;  %v1366_v10 = vpop.permute.xlu1 %1365  ;;  %v712_v50 = vadd.f32 %v4558_v21, %v642_v61  ;;  %v1647_v61 = vpop.permute.xlu0 %1646 }
 0x28c   : > { %v1456_v3 = vmul.f32 %v4564_v12, %v1366_v10  ;;  %v1102_v18 = vadd.f32 %v1038_v5, %v713_v54  ;;  %v5307_v54 = vld [vmem:[#allocation149_spill] sm:$0xff] }
 0x28d   : > { %2951 = vmatmul.mubr.msk.f32.gmra.mxu1 %vm1992_vm0, %v1972_v35  ;;  %v5295_v35 = vld [vmem:[#allocation74_spill] sm:$0xff]  ;;  %v1101_v20 = vadd.f32 %v1037_v39, %v712_v50  ;;  %v1429_v39 = vmul.f32 %v4564_v12, %v5305_v30  ;;  %v1428_v28 = vmul.f32 %v4564_v12, %v5307_v54  ;;  %v1818_v50 = vmul.f32 %v4538_v17, %v1647_v61 }
 0x28e   : > { %v1520_v57 = vadd.f32 %v1456_v3, %v1131_v62  ;;  %v674_v10 = vmul.f32 %v4544_v26, %v5295_v35  ;;  %v1491_v51 = vadd.f32 %v1427_v46, %v1102_v18  ;;  %v5300_v62 = vld [vmem:[#allocation17_spill] sm:$0xff] }
 0x28f   : > { %v1490_v8 = vadd.f32 %v1426_v48, %v1101_v20  ;;  %v1459_v23 = vmul.f32 %v4564_v12, %v5300_v62  ;;  %v5309_v48 = vld [vmem:[#allocation11_spill] sm:$0xff] }
 0x290   : > { %v1627_v24 = vpop.permute.xlu1 %1626  ;;  %v744_v43 = vadd.f32 %v4558_v21, %v674_v10  ;;  %v1880_v6 = vadd.f32 %v1816_v58, %v1491_v51  ;;  %v5308_v10 = vld [vmem:[#allocation129_spill] sm:$0xff]  ;;  %v677_v18 = vmul.f32 %v4544_v26, %v5309_v48 }
 0x291   : > { %v1813_v42 = vmul.f32 %v4538_v17, %v1627_v24  ;;  %v1071_v52 = vmul.f32 %v4525_v33, %v5308_v10 }
 0x292   : > { %v1133_v24 = vadd.f32 %v1069_v2, %v744_v43  ;;  %v5310_v43 = vld [vmem:[#allocation130_spill] sm:$0xff] }
 0x293   : > { %v1877_v19 = vadd.f32 %v1813_v42, %v1488_v47  ;;  %v1070_v47 = vmul.f32 %v4525_v33, %v5299_v56  ;;  %v745_v42 = vadd.f32 %v4558_v21, %v675_v37 }
 0x294   : > { %v1755_v60 = vpop.permute.xlu1 %1754 }
 0x295   : > { %v1941_v31 = vmax.f32 %v1877_v19, 0.0  ;;  %v1845_v34 = vmul.f32 %v4538_v17, %v1755_v60  ;;  %v1944_v60 = vmax.f32 %v1880_v6, 0.0  ;;  %v1134_v40 = vadd.f32 %v1070_v47, %v745_v42 }
 0x297   : > { %v1909_v29 = vadd.f32 %v1845_v34, %v1520_v57  ;;  %2905 = vmatprep.mubr.msk.f32.mxu0 %vm1992_vm0, %v1941_v31  ;;  %v1523_v31 = vadd.f32 %v1459_v23, %v1134_v40  ;;  %v5312_v40 = vld [vmem:[#allocation46_spill] sm:$0xff] }
 0x298   : > { %v1759_v53 = vpop.permute.xlu1 %1758  ;;  %2906 = vmatmul.mubr.msk.f32.gmra.mxu0 %vm1992_vm0, %v1942_v14 }
 0x299   : > { %v1973_v1 = vmax.f32 %v1909_v29, 0.0  ;;  %v1846_v27 = vmul.f32 %v4538_v17, %v1759_v53  ;;  %v645_v29 = vmul.f32 %v4544_v26, %v5301_v7  ;;  %v5302_v53 = vld [vmem:[#allocation45_spill] sm:$0xff] }
 0x29b   : > { %v1910_v55 = vadd.f32 %v1846_v27, %v1521_v25  ;;  %2953 = vmatprep.mubr.msk.f32.mxu1 %vm1992_vm0, %v1973_v1  ;;  %v644_v25 = vmul.f32 %v4544_v26, %v5302_v53  ;;  %v5303_v27 = vld [vmem:[#allocation101_spill] sm:$0xff]  ;;  %v715_v5 = vadd.f32 %v4558_v21, %v645_v29  ;;  %v5315_v29 = vld [vmem:[#allocation102_spill] sm:$0xff] }
 0x29c   : > { %v1040_v15 = vmul.f32 %v4525_v33, %v5303_v27  ;;  %v1041_v53 = vmul.f32 %v4525_v33, %v5315_v29 }
 0x29d   : > { %v1974_v9 = vmax.f32 %v1910_v55, 0.0  ;;  %v1374_v22 = vpop.permute.xlu1 %1373  ;;  %v714_v59 = vadd.f32 %v4558_v21, %v644_v25  ;;  %v1655_v25 = vpop.permute.xlu0 %1654 }
 0x29e   : > { %v1458_v16 = vmul.f32 %v4564_v12, %v1374_v22  ;;  %v1104_v46 = vadd.f32 %v1040_v15, %v715_v5  ;;  %v5318_v5 = vld [vmem:[#allocation151_spill] sm:$0xff] }
 0x29f   : > { %2954 = vmatmul.mubr.msk.f32.gmra.mxu1 %vm1992_vm0, %v1974_v9  ;;  %v5306_v9 = vld [vmem:[#allocation75_spill] sm:$0xff]  ;;  %v1103_v35 = vadd.f32 %v1039_v0, %v714_v59  ;;  %v1431_v0 = vmul.f32 %v4564_v12, %v5316_v44  ;;  %v1430_v30 = vmul.f32 %v4564_v12, %v5318_v5  ;;  %v1820_v59 = vmul.f32 %v4538_v17, %v1655_v25 }
 0x2a0   : > { %v1522_v32 = vadd.f32 %v1458_v16, %v1133_v24  ;;  %v676_v22 = vmul.f32 %v4544_v26, %v5306_v9  ;;  %v1493_v58 = vadd.f32 %v1429_v39, %v1104_v46  ;;  %v5311_v24 = vld [vmem:[#allocation19_spill] sm:$0xff] }
 0x2a1   : > { %v1492_v2 = vadd.f32 %v1428_v28, %v1103_v35  ;;  %v1461_v56 = vmul.f32 %v4564_v12, %v5311_v24  ;;  %v5320_v28 = vld [vmem:[#allocation14_spill] sm:$0xff] }
 0x2a2   : > { %v1635_v36 = vpop.permute.xlu1 %1634  ;;  %v746_v11 = vadd.f32 %v4558_v21, %v676_v22  ;;  %v1882_v51 = vadd.f32 %v1818_v50, %v1493_v58  ;;  %v5319_v22 = vld [vmem:[#allocation131_spill] sm:$0xff]  ;;  %v679_v46 = vmul.f32 %v4544_v26, %v5320_v28 }
 0x2a3   : > { %v1815_v38 = vmul.f32 %v4538_v17, %v1635_v36  ;;  %v1073_v54 = vmul.f32 %v4525_v33, %v5319_v22 }
 0x2a4   : > { %v1135_v36 = vadd.f32 %v1071_v52, %v746_v11  ;;  %v5321_v11 = vld [vmem:[#allocation132_spill] sm:$0xff] }
 0x2a5   : > { %v1879_v3 = vadd.f32 %v1815_v38, %v1490_v8  ;;  %v1072_v8 = vmul.f32 %v4525_v33, %v5310_v43  ;;  %v747_v38 = vadd.f32 %v4558_v21, %v677_v18 }
 0x2a6   : > { %v1763_v13 = vpop.permute.xlu1 %1762 }
 0x2a7   : > { %v1943_v19 = vmax.f32 %v1879_v3, 0.0  ;;  %v1847_v49 = vmul.f32 %v4538_v17, %v1763_v13  ;;  %v1946_v13 = vmax.f32 %v1882_v51, 0.0  ;;  %v1136_v62 = vadd.f32 %v1072_v8, %v747_v38 }
 0x2a9   : > { %v1911_v63 = vadd.f32 %v1847_v49, %v1522_v32  ;;  %2908 = vmatprep.mubr.msk.f32.mxu0 %vm1992_vm0, %v1943_v19  ;;  %v1525_v19 = vadd.f32 %v1461_v56, %v1136_v62 }
 0x2aa   : > { %v1767_v57 = vpop.permute.xlu1 %1766  ;;  %2909 = vmatmul.mubr.msk.f32.gmra.mxu0 %vm1992_vm0, %v1944_v60 }
 0x2ab   : > { %v1975_v34 = vmax.f32 %v1911_v63, 0.0  ;;  %v1848_v14 = vmul.f32 %v4538_v17, %v1767_v57  ;;  %v647_v63 = vmul.f32 %v4544_v26, %v5312_v40  ;;  %v5313_v57 = vld [vmem:[#allocation47_spill] sm:$0xff] }
 0x2ad   : > { %v1912_v1 = vadd.f32 %v1848_v14, %v1523_v31  ;;  %2956 = vmatprep.mubr.msk.f32.mxu1 %vm1992_vm0, %v1975_v34  ;;  %v646_v31 = vmul.f32 %v4544_v26, %v5313_v57  ;;  %v5314_v14 = vld [vmem:[#allocation103_spill] sm:$0xff]  ;;  %v717_v15 = vadd.f32 %v4558_v21, %v647_v63 }
 0x2ae   : > { %v1042_v7 = vmul.f32 %v4525_v33, %v5314_v14 }
 0x2af   : > { %v1976_v55 = vmax.f32 %v1912_v1, 0.0  ;;  %v1382_v41 = vpop.permute.xlu1 %1381  ;;  %v716_v61 = vadd.f32 %v4558_v21, %v646_v31 }
 0x2b0   : > { %v1460_v4 = vmul.f32 %v4564_v12, %v1382_v41  ;;  %v1106_v39 = vadd.f32 %v1042_v7, %v717_v15 }
 0x2b1   : > { %2957 = vmatmul.mubr.msk.f32.gmra.mxu1 %vm1992_vm0, %v1976_v55  ;;  %v5317_v55 = vld [vmem:[#allocation13_spill] sm:$0xff]  ;;  %v1105_v9 = vadd.f32 %v1041_v53, %v716_v61 }
 0x2b2   : > { %v1524_v47 = vadd.f32 %v1460_v4, %v1135_v36  ;;  %v678_v41 = vmul.f32 %v4544_v26, %v5317_v55  ;;  %v1495_v50 = vadd.f32 %v1431_v0, %v1106_v39  ;;  %v1463_v26 = vmul.f32 %v4564_v12, %v4180_v45 }
 0x2b3   : > { %v1494_v52 = vadd.f32 %v1430_v30, %v1105_v9 }
 0x2b4   : > { %v1643_v20 = vpop.permute.xlu1 %1642  ;;  %v748_v10 = vadd.f32 %v4558_v21, %v678_v41  ;;  %v1884_v58 = vadd.f32 %v1820_v59, %v1495_v50 }
 0x2b5   : > { %v1817_v37 = vmul.f32 %v4538_v17, %v1643_v20 }
 0x2b6   : > { %v1137_v20 = vadd.f32 %v1073_v54, %v748_v10 }
 0x2b7   : > { %v1881_v16 = vadd.f32 %v1817_v37, %v1492_v2  ;;  %v1074_v2 = vmul.f32 %v4525_v33, %v5321_v11  ;;  %v749_v37 = vadd.f32 %v4558_v21, %v679_v46 }
 0x2b8   : > { %v1771_v6 = vpop.permute.xlu1 %1770 }
 0x2b9   : > { %v1945_v3 = vmax.f32 %v1881_v16, 0.0  ;;  %v1849_v42 = vmul.f32 %v4538_v17, %v1771_v6  ;;  %v1948_v16 = vmax.f32 %v1884_v58, 0.0  ;;  %v1138_v38 = vadd.f32 %v1074_v2, %v749_v37 }
 0x2bb   : > { %v1913_v23 = vadd.f32 %v1849_v42, %v1524_v47  ;;  %2911 = vmatprep.mubr.msk.f32.mxu0 %vm1992_vm0, %v1945_v3  ;;  %v1527_v33 = vadd.f32 %v1463_v26, %v1138_v38 }
 0x2bc   : > { %v1775_v32 = vpop.permute.xlu1 %1774  ;;  %2912 = vmatmul.mubr.msk.f32.gmra.mxu0 %vm1992_vm0, %v1946_v13 }
 0x2bd   : > { %v1977_v49 = vmax.f32 %v1913_v23, 0.0  ;;  %v1850_v60 = vmul.f32 %v4538_v17, %v1775_v32 }
 0x2bf   : > { %v1914_v34 = vadd.f32 %v1850_v60, %v1525_v19  ;;  %2959 = vmatprep.mubr.msk.f32.mxu1 %vm1992_vm0, %v1977_v49 }
 0x2c1   : > { %v1978_v1 = vmax.f32 %v1914_v34, 0.0  ;;  %v1390_v27 = vpop.permute.xlu1 %1389 }
 0x2c2   : > { %v1462_v48 = vmul.f32 %v4564_v12, %v1390_v27  ;;  %v4739_v12 = vld [vmem:[%s4926_s4] ss:$0 sm:$0xff] }
 0x2c3   : > { %2960 = vmatmul.mubr.msk.f32.gmra.mxu1 %vm1992_vm0, %v1978_v1 }
 0x2c4   : > { %v1526_v36 = vadd.f32 %v1462_v48, %v1137_v20 }
 0x2c6   : > { %v1651_v35 = vpop.permute.xlu1 %1650 }
 0x2c7   : > { %v1819_v18 = vmul.f32 %v4538_v17, %v1651_v35 }
 0x2c9   : > { %v1883_v4 = vadd.f32 %v1819_v18, %v1494_v52 }
 0x2ca   : > { %v1779_v51 = vpop.permute.xlu1 %1778 }
 0x2cb   : > { %v1947_v43 = vmax.f32 %v1883_v4, 0.0  ;;  %v1851_v8 = vmul.f32 %v4538_v17, %v1779_v51 }
 0x2cd   : > { %v1915_v6 = vadd.f32 %v1851_v8, %v1526_v36  ;;  %2914 = vmatprep.mubr.msk.f32.mxu0 %vm1992_vm0, %v1947_v43 }
 0x2ce   : > { %v1783_v24 = vpop.permute.xlu1 %1782  ;;  %2915 = vmatmul.mubr.msk.f32.gmra.mxu0 %vm1992_vm0, %v1948_v16 }
 0x2cf   : > { %v1979_v21 = vmax.f32 %v1915_v6, 0.0  ;;  %v1852_v56 = vmul.f32 %v4538_v17, %v1783_v24 }
 0x2d1   : > { %v1916_v47 = vadd.f32 %v1852_v56, %v1527_v33  ;;  %2962 = vmatprep.mubr.msk.f32.mxu1 %vm1992_vm0, %v1979_v21 }
 0x2d3   : > { %v1980_v45 = vmax.f32 %v1916_v47, 0.0 }
 0x2d5   : > { %2963 = vmatmul.mubr.msk.f32.gmra.mxu1 %vm1992_vm0, %v1980_v45 }
 0x2dc   : > { %v2871_v3 = vpop.f32.mrf.mxu0 }
 0x2dd   : > { %v2257_v42 = vadd.f32 %v2871_v3, %v4739_v12 }
 0x2de   : > { %v2251_v13 = vpop.f32.mrf.mxu0 }
 0x2df   : > { %2571 = vst [vmem:[%s4742_s11 + $0x8] sm:$0xff] %v2257_v42  ;;  %v2252_v17 = vadd.f32 %v4739_v12, %v2251_v13  ;;  %v2919_v62 = vpop.f32.mrf.mxu1 }
 0x2e0   : > { %v2417_v23 = vadd.f32 %v2919_v62, %v4739_v12  ;;  %v2874_v32 = vpop.f32.mrf.mxu0 }
 0x2e1   : > { %2570 = vst [vmem:[%s4742_s11] sm:$0xff] %v2252_v17  ;;  %v2267_v19 = vadd.f32 %v2874_v32, %v4739_v12  ;;  %v2411_v49 = vpop.f32.mrf.mxu1 }
 0x2e2   : > { %2603 = vst [vmem:[%s4742_s11 + $0x108] sm:$0xff] %v2417_v23  ;;  %v2412_v60 = vadd.f32 %v4739_v12, %v2411_v49  ;;  %v2261_v40 = vpop.f32.mrf.mxu0 }
 0x2e3   : > { %2573 = vst [vmem:[%s4742_s11 + $0x18] sm:$0xff] %v2267_v19  ;;  %v2262_v63 = vadd.f32 %v4739_v12, %v2261_v40 }
 0x2e4   : > { %2602 = vst [vmem:[%s4742_s11 + $0x100] sm:$0xff] %v2412_v60  ;;  %v2877_v57 = vpop.f32.mrf.mxu0 }
 0x2e5   : > { %2572 = vst [vmem:[%s4742_s11 + $0x10] sm:$0xff] %v2262_v63  ;;  %v2277_v31 = vadd.f32 %v2877_v57, %v4739_v12 }
 0x2e6   : > { %v2271_v34 = vpop.f32.mrf.mxu0 }
 0x2e7   : > { %2575 = vst [vmem:[%s4742_s11 + $0x28] sm:$0xff] %v2277_v31  ;;  %v2272_v14 = vadd.f32 %v4739_v12, %v2271_v34  ;;  %v2922_v7 = vpop.f32.mrf.mxu1 }
 0x2e8   : > { %v2427_v29 = vadd.f32 %v2922_v7, %v4739_v12  ;;  %v2880_v53 = vpop.f32.mrf.mxu0 }
 0x2e9   : > { %2574 = vst [vmem:[%s4742_s11 + $0x20] sm:$0xff] %v2272_v14  ;;  %v2287_v25 = vadd.f32 %v2880_v53, %v4739_v12  ;;  %v2421_v1 = vpop.f32.mrf.mxu1 }
 0x2ea   : > { %2605 = vst [vmem:[%s4742_s11 + $0x118] sm:$0xff] %v2427_v29  ;;  %v2422_v27 = vadd.f32 %v4739_v12, %v2421_v1  ;;  %v2281_v15 = vpop.f32.mrf.mxu0 }
 0x2eb   : > { %2577 = vst [vmem:[%s4742_s11 + $0x38] sm:$0xff] %v2287_v25  ;;  %v2282_v44 = vadd.f32 %v4739_v12, %v2281_v15 }
 0x2ec   : > { %2604 = vst [vmem:[%s4742_s11 + $0x110] sm:$0xff] %v2422_v27  ;;  %v2883_v0 = vpop.f32.mrf.mxu0 }
 0x2ed   : > { %2576 = vst [vmem:[%s4742_s11 + $0x30] sm:$0xff] %v2282_v44  ;;  %v2297_v61 = vadd.f32 %v2883_v0, %v4739_v12 }
 0x2ee   : > { %v2291_v55 = vpop.f32.mrf.mxu0 }
 0x2ef   : > { %2579 = vst [vmem:[%s4742_s11 + $0x48] sm:$0xff] %v2297_v61  ;;  %v2292_v41 = vadd.f32 %v4739_v12, %v2291_v55  ;;  %v2925_v5 = vpop.f32.mrf.mxu1 }
 0x2f0   : > { %v2437_v30 = vadd.f32 %v2925_v5, %v4739_v12  ;;  %v2886_v39 = vpop.f32.mrf.mxu0 }
 0x2f1   : > { %2578 = vst [vmem:[%s4742_s11 + $0x40] sm:$0xff] %v2292_v41  ;;  %v2307_v59 = vadd.f32 %v2886_v39, %v4739_v12  ;;  %v2431_v9 = vpop.f32.mrf.mxu1 }
 0x2f2   : > { %2607 = vst [vmem:[%s4742_s11 + $0x128] sm:$0xff] %v2437_v30  ;;  %v2432_v22 = vadd.f32 %v4739_v12, %v2431_v9  ;;  %v2301_v54 = vpop.f32.mrf.mxu0 }
 0x2f3   : > { %2581 = vst [vmem:[%s4742_s11 + $0x58] sm:$0xff] %v2307_v59  ;;  %v2302_v28 = vadd.f32 %v4739_v12, %v2301_v54 }
 0x2f4   : > { %2606 = vst [vmem:[%s4742_s11 + $0x120] sm:$0xff] %v2432_v22  ;;  %v2889_v46 = vpop.f32.mrf.mxu0 }
 0x2f5   : > { %2580 = vst [vmem:[%s4742_s11 + $0x50] sm:$0xff] %v2302_v28  ;;  %v2317_v50 = vadd.f32 %v2889_v46, %v4739_v12 }
 0x2f6   : > { %v2311_v35 = vpop.f32.mrf.mxu0 }
 0x2f7   : > { %2583 = vst [vmem:[%s4742_s11 + $0x68] sm:$0xff] %v2317_v50  ;;  %v2312_v10 = vadd.f32 %v4739_v12, %v2311_v35  ;;  %v2928_v52 = vpop.f32.mrf.mxu1 }
 0x2f8   : > { %v2447_v48 = vadd.f32 %v2928_v52, %v4739_v12 }
 0x2f9   : > { %2582 = vst [vmem:[%s4742_s11 + $0x60] sm:$0xff] %v2312_v10  ;;  %v2441_v18 = vpop.f32.mrf.mxu1 }
 0x2fa   : > { %2609 = vst [vmem:[%s4742_s11 + $0x138] sm:$0xff] %v2447_v48  ;;  %v2442_v58 = vadd.f32 %v4739_v12, %v2441_v18 }
 0x2fc   : > { %2608 = vst [vmem:[%s4742_s11 + $0x130] sm:$0xff] %v2442_v58 }
 0x2ff   : > { %v2931_v20 = vpop.f32.mrf.mxu1 }
 0x300   : > { %v2457_v11 = vadd.f32 %v2931_v20, %v4739_v12 }
 0x301   : > { %v2451_v2 = vpop.f32.mrf.mxu1 }
 0x302   : > { %2611 = vst [vmem:[%s4742_s11 + $0x148] sm:$0xff] %v2457_v11  ;;  %v2452_v4 = vadd.f32 %v4739_v12, %v2451_v2 }
 0x304   : > { %2610 = vst [vmem:[%s4742_s11 + $0x140] sm:$0xff] %v2452_v4 }
 0x307   : > { %v2934_v37 = vpop.f32.mrf.mxu1 }
 0x308   : > { %v2467_v51 = vadd.f32 %v2934_v37, %v4739_v12 }
 0x309   : > { %v2461_v26 = vpop.f32.mrf.mxu1 }
 0x30a   : > { %2613 = vst [vmem:[%s4742_s11 + $0x158] sm:$0xff] %v2467_v51  ;;  %v2462_v36 = vadd.f32 %v4739_v12, %v2461_v26 }
 0x30c   : > { %2612 = vst [vmem:[%s4742_s11 + $0x150] sm:$0xff] %v2462_v36 }
 0x30f   : > { %v2937_v43 = vpop.f32.mrf.mxu1 }
 0x310   : > { %v2477_v8 = vadd.f32 %v2937_v43, %v4739_v12 }
 0x311   : > { %v2471_v16 = vpop.f32.mrf.mxu1 }
 0x312   : > { %2615 = vst [vmem:[%s4742_s11 + $0x168] sm:$0xff] %v2477_v8  ;;  %v2472_v38 = vadd.f32 %v4739_v12, %v2471_v16 }
 0x313   : > { %v2892_v6 = vpop.f32.mrf.mxu0 }
 0x314   : > { %2614 = vst [vmem:[%s4742_s11 + $0x160] sm:$0xff] %v2472_v38  ;;  %v2327_v24 = vadd.f32 %v2892_v6, %v4739_v12  ;;  %v2940_v33 = vpop.f32.mrf.mxu1 }
 0x315   : > { %v2487_v21 = vadd.f32 %v2940_v33, %v4739_v12  ;;  %v2321_v56 = vpop.f32.mrf.mxu0 }
 0x316   : > { %2585 = vst [vmem:[%s4742_s11 + $0x78] sm:$0xff] %v2327_v24  ;;  %v2322_v47 = vadd.f32 %v4739_v12, %v2321_v56  ;;  %v2481_v45 = vpop.f32.mrf.mxu1 }
 0x317   : > { %2617 = vst [vmem:[%s4742_s11 + $0x178] sm:$0xff] %v2487_v21  ;;  %v2482_v3 = vadd.f32 %v4739_v12, %v2481_v45  ;;  %v2895_v42 = vpop.f32.mrf.mxu0 }
 0x318   : > { %2584 = vst [vmem:[%s4742_s11 + $0x70] sm:$0xff] %v2322_v47  ;;  %v2337_v13 = vadd.f32 %v2895_v42, %v4739_v12  ;;  %v2943_v17 = vpop.f32.mrf.mxu1 }
 0x319   : > { %2616 = vst [vmem:[%s4742_s11 + $0x170] sm:$0xff] %v2482_v3  ;;  %v2497_v62 = vadd.f32 %v2943_v17, %v4739_v12  ;;  %v2331_v23 = vpop.f32.mrf.mxu0 }
 0x31a   : > { %2587 = vst [vmem:[%s4742_s11 + $0x88] sm:$0xff] %v2337_v13  ;;  %v2332_v32 = vadd.f32 %v4739_v12, %v2331_v23  ;;  %v2491_v19 = vpop.f32.mrf.mxu1 }
 0x31b   : > { %2619 = vst [vmem:[%s4742_s11 + $0x188] sm:$0xff] %v2497_v62  ;;  %v2492_v49 = vadd.f32 %v4739_v12, %v2491_v19 }
 0x31c   : > { %2586 = vst [vmem:[%s4742_s11 + $0x80] sm:$0xff] %v2332_v32 }
 0x31d   : > { %2618 = vst [vmem:[%s4742_s11 + $0x180] sm:$0xff] %v2492_v49 }
 0x322   : > { %v2898_v60 = vpop.f32.mrf.mxu0 }
 0x323   : > { %v2347_v40 = vadd.f32 %v2898_v60, %v4739_v12 }
 0x324   : > { %v2341_v63 = vpop.f32.mrf.mxu0 }
 0x325   : > { %2589 = vst [vmem:[%s4742_s11 + $0x98] sm:$0xff] %v2347_v40  ;;  %v2342_v57 = vadd.f32 %v4739_v12, %v2341_v63 }
 0x327   : > { %2588 = vst [vmem:[%s4742_s11 + $0x90] sm:$0xff] %v2342_v57 }
 0x329   : > { %v2946_v31 = vpop.f32.mrf.mxu1 }
 0x32a   : > { %v2507_v34 = vadd.f32 %v2946_v31, %v4739_v12 }
 0x32b   : > { %v2501_v14 = vpop.f32.mrf.mxu1 }
 0x32c   : > { %2621 = vst [vmem:[%s4742_s11 + $0x198] sm:$0xff] %v2507_v34  ;;  %v2502_v7 = vadd.f32 %v4739_v12, %v2501_v14 }
 0x32e   : > { %2620 = vst [vmem:[%s4742_s11 + $0x190] sm:$0xff] %v2502_v7 }
 0x334   : > { %v2901_v29 = vpop.f32.mrf.mxu0 }
 0x335   : > { %v2357_v53 = vadd.f32 %v2901_v29, %v4739_v12 }
 0x336   : > { %v2351_v25 = vpop.f32.mrf.mxu0 }
 0x337   : > { %2591 = vst [vmem:[%s4742_s11 + $0xa8] sm:$0xff] %v2357_v53  ;;  %v2352_v1 = vadd.f32 %v4739_v12, %v2351_v25 }
 0x339   : > { %2590 = vst [vmem:[%s4742_s11 + $0xa0] sm:$0xff] %v2352_v1 }
 0x33b   : > { %v2949_v27 = vpop.f32.mrf.mxu1 }
 0x33c   : > { %v2517_v15 = vadd.f32 %v2949_v27, %v4739_v12 }
 0x33d   : > { %v2511_v44 = vpop.f32.mrf.mxu1 }
 0x33e   : > { %2623 = vst [vmem:[%s4742_s11 + $0x1a8] sm:$0xff] %v2517_v15  ;;  %v2512_v0 = vadd.f32 %v4739_v12, %v2511_v44 }
 0x340   : > { %2622 = vst [vmem:[%s4742_s11 + $0x1a0] sm:$0xff] %v2512_v0 }
 0x346   : > { %v2904_v61 = vpop.f32.mrf.mxu0 }
 0x347   : > { %v2367_v55 = vadd.f32 %v2904_v61, %v4739_v12 }
 0x348   : > { %v2361_v41 = vpop.f32.mrf.mxu0 }
 0x349   : > { %2593 = vst [vmem:[%s4742_s11 + $0xb8] sm:$0xff] %v2367_v55  ;;  %v2362_v5 = vadd.f32 %v4739_v12, %v2361_v41 }
 0x34b   : > { %2592 = vst [vmem:[%s4742_s11 + $0xb0] sm:$0xff] %v2362_v5 }
 0x34d   : > { %v2952_v30 = vpop.f32.mrf.mxu1 }
 0x34e   : > { %v2527_v39 = vadd.f32 %v2952_v30, %v4739_v12 }
 0x34f   : > { %v2521_v59 = vpop.f32.mrf.mxu1 }
 0x350   : > { %2625 = vst [vmem:[%s4742_s11 + $0x1b8] sm:$0xff] %v2527_v39  ;;  %v2522_v9 = vadd.f32 %v4739_v12, %v2521_v59 }
 0x352   : > { %2624 = vst [vmem:[%s4742_s11 + $0x1b0] sm:$0xff] %v2522_v9 }
 0x358   : > { %v2907_v22 = vpop.f32.mrf.mxu0 }
 0x359   : > { %v2377_v54 = vadd.f32 %v2907_v22, %v4739_v12 }
 0x35a   : > { %v2371_v28 = vpop.f32.mrf.mxu0 }
 0x35b   : > { %2595 = vst [vmem:[%s4742_s11 + $0xc8] sm:$0xff] %v2377_v54  ;;  %v2372_v46 = vadd.f32 %v4739_v12, %v2371_v28 }
 0x35d   : > { %2594 = vst [vmem:[%s4742_s11 + $0xc0] sm:$0xff] %v2372_v46 }
 0x35f   : > { %v2955_v50 = vpop.f32.mrf.mxu1 }
 0x360   : > { %v2537_v35 = vadd.f32 %v2955_v50, %v4739_v12 }
 0x361   : > { %v2531_v10 = vpop.f32.mrf.mxu1 }
 0x362   : > { %2627 = vst [vmem:[%s4742_s11 + $0x1c8] sm:$0xff] %v2537_v35  ;;  %v2532_v52 = vadd.f32 %v4739_v12, %v2531_v10 }
 0x364   : > { %2626 = vst [vmem:[%s4742_s11 + $0x1c0] sm:$0xff] %v2532_v52 }
 0x36a   : > { %v2910_v48 = vpop.f32.mrf.mxu0 }
 0x36b   : > { %v2387_v18 = vadd.f32 %v2910_v48, %v4739_v12 }
 0x36c   : > { %v2381_v58 = vpop.f32.mrf.mxu0 }
 0x36d   : > { %2597 = vst [vmem:[%s4742_s11 + $0xd8] sm:$0xff] %v2387_v18  ;;  %v2382_v20 = vadd.f32 %v4739_v12, %v2381_v58 }
 0x36f   : > { %2596 = vst [vmem:[%s4742_s11 + $0xd0] sm:$0xff] %v2382_v20 }
 0x371   : > { %v2958_v11 = vpop.f32.mrf.mxu1 }
 0x372   : > { %v2547_v2 = vadd.f32 %v2958_v11, %v4739_v12 }
 0x373   : > { %v2541_v4 = vpop.f32.mrf.mxu1 }
 0x374   : > { %2629 = vst [vmem:[%s4742_s11 + $0x1d8] sm:$0xff] %v2547_v2  ;;  %v2542_v37 = vadd.f32 %v4739_v12, %v2541_v4 }
 0x376   : > { %2628 = vst [vmem:[%s4742_s11 + $0x1d0] sm:$0xff] %v2542_v37 }
 0x37c   : > { %v2913_v51 = vpop.f32.mrf.mxu0 }
 0x37d   : > { %v2397_v26 = vadd.f32 %v2913_v51, %v4739_v12 }
 0x37e   : > { %v2391_v36 = vpop.f32.mrf.mxu0 }
 0x37f   : > { %2599 = vst [vmem:[%s4742_s11 + $0xe8] sm:$0xff] %v2397_v26  ;;  %v2392_v43 = vadd.f32 %v4739_v12, %v2391_v36 }
 0x381   : > { %2598 = vst [vmem:[%s4742_s11 + $0xe0] sm:$0xff] %v2392_v43 }
 0x383   : > { %v2961_v8 = vpop.f32.mrf.mxu1 }
 0x384   : > { %v2557_v16 = vadd.f32 %v2961_v8, %v4739_v12 }
 0x385   : > { %v2551_v38 = vpop.f32.mrf.mxu1 }
 0x386   : > { %2631 = vst [vmem:[%s4742_s11 + $0x1e8] sm:$0xff] %v2557_v16  ;;  %v2552_v6 = vadd.f32 %v4739_v12, %v2551_v38 }
 0x388   : > { %2630 = vst [vmem:[%s4742_s11 + $0x1e0] sm:$0xff] %v2552_v6 }
 0x38e   : > { %v2916_v24 = vpop.f32.mrf.mxu0 }
 0x38f   : > { %v2407_v33 = vadd.f32 %v2916_v24, %v4739_v12 }
 0x390   : > { %v2401_v21 = vpop.f32.mrf.mxu0 }
 0x391   : > { %2601 = vst [vmem:[%s4742_s11 + $0xf8] sm:$0xff] %v2407_v33  ;;  %v2402_v56 = vadd.f32 %v4739_v12, %v2401_v21 }
 0x393   : > { %2600 = vst [vmem:[%s4742_s11 + $0xf0] sm:$0xff] %v2402_v56 }
 0x395   : > { %v2964_v47 = vpop.f32.mrf.mxu1 }
 0x396   : > { %v2567_v45 = vadd.f32 %v2964_v47, %v4739_v12 }
 0x397   : > { %v2561_v3 = vpop.f32.mrf.mxu1 }
 0x398   : > { %2633 = vst [vmem:[%s4742_s11 + $0x1f8] sm:$0xff] %v2567_v45  ;;  %v2562_v42 = vadd.f32 %v4739_v12, %v2561_v3 }
 0x39a   : > { %2632 = vst [vmem:[%s4742_s11 + $0x1f0] sm:$0xff] %v2562_v42 }
 0x39b   : > { %3074 = shalt.err (!%p3071_p3)
}
 0x39c   : > { %s3075_s26 = scalar_lea.hbm %s4873_s15, 8192  ;;  %s3079_s7 = scalar_lea.hbm %s4927_s5, 16384 }
 0x39d   : > { %p3076_p4 = scmp.ne.s32.totalorder %s4873_s15, %s3075_s26  ;;  %p3080_p9 = scmp.lt.s32.totalorder %s4873_s15, %s4927_s5 }
 0x39e   : > { %p3081_p10 = scmp.lt.s32.totalorder %s3079_s7, %s3075_s26 }
 0x39f   : > { %p3077_p7 = pnand %p3076_p4, %p3198_p5 }
 0x3a0   : > { %p3082_p11 = por %p3081_p10, %p3080_p9 }
 0x3a1   : > { %p3078_p8 = pneg %p3077_p7 }
 0x3a3   : > { %p3083_p12 = pnand %p3082_p11, %p3078_p8 }
 0x3a5   : > { %3086 = shalt.err (!%p3083_p12)
}
 0x3a6   : > { %s3128_s11 = smov 128   ;;  %s3129_s12 = smov 8  }
 0x3a7   : > { %2973 = dma.vmem_to_hbm [thread:$0]  (%p3198_p5), %s4875_s9, 8192, %s4873_s15, %s4882_s22, %s3128_s11, %s3128_s11, %s3129_s12  }
 0x3a8 PF: > { %p2979_p13 = scmp.ge.s32.totalorder %s3121_s21, 2  ;;  %s2663_s13 = sand.u32 1, %s3109_s18  }
 0x3a9   : > { %s2664_s14 = scalar_lea.sflag [#allocation3], %s2663_s13 }
 0x3aa   : > { %p2976_p0 = pnand %p2979_p13, %p3202_p6 }
 0x3ac   : > { %p2977_p1 = pneg %p2976_p0 }
 0x3ae   : > { %3104 = dma.done.wait (%p2977_p1), %s2664_s14, 8192  }
 0x3af   : > { %3106 = vsyncadd (%p2977_p1), %s2664_s14, 4294959104  ;;  %p15_p2 = scmp.ge.s32.totalorder %s3185_s24, 4   ;;  %s5322_s18 = smov %s3113_s19 }
 0x3b0   : > { %s5323_s19 = smov %s3117_s20  ;;  %s5324_s20 = smov %s3196_s27 }
 0x3b1   : > { %s5325_s21 = smov %s3185_s24  ;;  %17 = sbr.rel (!%p15_p2) target bundleno = 3 (0x3), region = 75 }
 0x3b6   :  { %2669 = vsyncpa [#allocation3], 1 }
 0x3b7   :  { %2671 = vsyncpa [#allocation3 + $0x1], 1 }

</bundles_post_ra>
